<compile_context>
chip_gen: v6e
topology: v6e:2x2x1
jax: 0.10.0
libtpu: 0.0.40
codegen_flags: <defaults>
</compile_context>

<pallas_src>
from functools import partial

import jax
import jax.numpy as jnp
from jax.experimental import pallas as pl
from jax.experimental.pallas import tpu as pltpu

NEG_SLOPE = 0.2        # PyG GATConv default negative_slope
MASK_VALUE = -1e30


def _round_up(v, m):
    return (v + m - 1) // m * m


# ---------------------------------------------------------------------------
# Fused, gridded kernel.  Grid = (dst tiles, relations, src tiles).
#   xd_ref   : [tm, fip]      bf16   x rows of the current dst tile (+ ones col)
#   xs_ref   : [tk, fip]      bf16   x rows of the current src tile
#   xt_ref   : [fip, tk]      bf16   x^T columns of the current src tile
#   cnt_ref  : [1, tm, tk]    bf16   edge multiplicities cnt[r, dst, src]
#   waug_ref : [1, fip, faug] bf16   [ W_r | v_dst_r | ones-route | 0-pad ]
#   vsrc_ref : [1, 1, fip]    bf16   v_src_r = W_r @ att_src_r
#   wself_ref: [fip, fop]     bf16   self-loop Linear weight
#   b_ref    : [1, fop]       f32    b_self + sum_r b_rel
#   out_ref  : [tm, fop]      f32    resident accumulator across (r, k)
# Scratch: m_sc [tm,1], acc_sc [tm,faug], adst_sc [tm,1]  (all f32)
# ---------------------------------------------------------------------------
def _rgat_kernel(xd_ref, xs_ref, xt_ref, cnt_ref, waug_ref, vsrc_ref, wself_ref,
                 b_ref, out_ref, m_sc, acc_sc, adst_sc, *, fout, fop):
    r = pl.program_id(1)
    k = pl.program_id(2)
    nr = pl.num_programs(1)
    nk = pl.num_programs(2)

    # ---- once per dst tile: init output with the self-loop Linear ------------
    @pl.when(jnp.logical_and(r == 0, k == 0))
    def _():
        out_ref[...] = jnp.dot(xd_ref[...], wself_ref[...],
                               preferred_element_type=jnp.float32)

    # ---- once per (dst tile, relation): flash state + dst attention term -----
    @pl.when(k == 0)
    def _():
        m_sc[...] = jnp.full_like(m_sc, MASK_VALUE)
        acc_sc[...] = jnp.zeros_like(acc_sc)
        hd = jnp.dot(xd_ref[...], waug_ref[0],
                     preferred_element_type=jnp.float32)          # [tm, faug]
        adst_sc[...] = hd[:, fout:fout + 1]                       # a_dst column

    # ---- every step: project src tile, logits, online softmax, aggregate -----
    # h_src columns: [ h (fout) | a_dst-junk | ones ] -> ones column gives the
    # softmax denominator directly out of the aggregation matmul.
    h_src = jnp.dot(xs_ref[...], waug_ref[0],
                    preferred_element_type=jnp.float32)           # [tk, faug]
    # a_src in lane orientation via a tiny (M=1, K=fip) matmul on x^T.
    a_src = jnp.dot(vsrc_ref[0], xt_ref[...],
                    preferred_element_type=jnp.float32)           # [1, tk]

    logits = adst_sc[...] + a_src                                 # [tm, tk]
    logits = jnp.where(logits > 0, logits, NEG_SLOPE * logits)    # LeakyReLU

    cnt = cnt_ref[0].astype(jnp.float32)                          # [tm, tk]
    z = jnp.where(cnt > 0, logits, MASK_VALUE)
    m_new = jnp.maximum(m_sc[...], jnp.max(z, axis=1, keepdims=True))
    scale = jnp.exp(m_sc[...] - m_new)                            # rescale old acc
    p = cnt * jnp.exp(z - m_new)                                  # unnormalised alpha
    acc_sc[...] = scale * acc_sc[...] + jnp.dot(
        p.astype(jnp.bfloat16), h_src.astype(jnp.bfloat16),
        preferred_element_type=jnp.float32)
    m_sc[...] = m_new

    # ---- end of src sweep for this relation: normalise and accumulate --------
    @pl.when(k == nk - 1)
    def _():
        acc = acc_sc[...]
        inv = pl.reciprocal(acc[:, fout + 1:fout + 2], approx=True)   # 1 / denom
        out_ref[...] += acc[:, :fop] * inv

    # ---- very last step for this dst tile: add folded biases -----------------
    @pl.when(jnp.logical_and(r == nr - 1, k == nk - 1))
    def _():
        out_ref[...] += b_ref[...]


# ---------------------------------------------------------------------------
# Wrapper: pads/stacks weights, builds dense per-relation edge counts, tiles.
# ---------------------------------------------------------------------------
def rgat_conv(x, edge_index, edge_type, params, *, tile=512):
    f32, bf16 = jnp.float32, jnp.bfloat16
    n, fin = x.shape
    num_rel, _, fout = params["w_rel"].shape

    npad = _round_up(max(n, 1), 128)        # node axis (lanes of cnt / logits)
    tile = min(tile, npad)
    npad = _round_up(npad, tile)
    fip = _round_up(fin + 1, 16)            # contraction dim (+1 ones column)
    fop = _round_up(fout, 128)              # lane-dense output columns
    faug = _round_up(fout + 2, 128)         # [ W_r | v_dst | ones ] columns

    # x augmented with a ones column (routes the denominator through the MXU).
    x_aug = jnp.zeros((npad, fip), f32).at[:n, :fin].set(x.astype(f32))
    x_aug = x_aug.at[:n, fin].set(1.0)
    x_bf = x_aug.astype(bf16)
    xT_bf = x_aug.T.astype(bf16)            # wrapper-side layout plumbing for a_src

    # Dense per-relation edge counts cnt[r, dst, src].  GATConv removes existing
    # self loops and adds exactly one per node -> force the diagonal to 1 (also on
    # padded rows, which keeps every softmax denominator > 0; padded rows are
    # sliced away at the end).  bf16 is exact for counts < 256 and halves the
    # dominant HBM stream.
    src, dst = edge_index[0], edge_index[1]
    cnt = jnp.zeros((num_rel, npad, npad), f32).at[edge_type, dst, src].add(1.0)
    eye = jnp.eye(npad, dtype=f32)
    cnt = (cnt * (1.0 - eye)[None] + eye[None]).astype(bf16)
    # TODO(synk): for E << N^2 replace the dense [R, Np, Np] counts with a
    # scalar-prefetch edge-list gather (PrefetchScalarGridSpec) per dst tile.

    w_rel = params["w_rel"].astype(f32)
    v_dst = jnp.einsum("rio,ro->ri", w_rel, params["att_dst"].astype(f32))
    v_srcv = jnp.einsum("rio,ro->ri", w_rel, params["att_src"].astype(f32))

    # Per-relation augmented weights: cols [0:fout]=W_r, col fout=v_dst,
    # col fout+1 = ones-route (picks up the ones column of x_aug).
    w_aug = jnp.zeros((num_rel, fip, faug), f32)
    w_aug = w_aug.at[:, :fin, :fout].set(w_rel)
    w_aug = w_aug.at[:, :fin, fout].set(v_dst)
    w_aug = w_aug.at[:, fin, fout + 1].set(1.0)
    w_aug = w_aug.astype(bf16)

    v_src = jnp.zeros((num_rel, 1, fip), f32).at[:, 0, :fin].set(v_srcv).astype(bf16)

    w_self = jnp.zeros((fip, fop), f32).at[:fin, :fout].set(
        params["w_self"].astype(f32)).astype(bf16)

    # all biases commute with the relation sum -> fold into a single add
    b_total = params["b_self"].astype(f32) + params["b_rel"].astype(f32).sum(axis=0)
    b = jnp.zeros((1, fop), f32).at[0, :fout].set(b_total)

    grid = (npad // tile, num_rel, npad // tile)
    kernel = partial(_rgat_kernel, fout=fout, fop=fop)

    out = pl.pallas_call(
        kernel,
        out_shape=jax.ShapeDtypeStruct((npad, fop), f32),
        grid_spec=pltpu.PrefetchScalarGridSpec(
            num_scalar_prefetch=0,
            grid=grid,
            in_specs=[
                pl.BlockSpec((tile, fip), lambda i, r, k: (i, 0)),        # x  (dst)
                pl.BlockSpec((tile, fip), lambda i, r, k: (k, 0)),        # x  (src)
                pl.BlockSpec((fip, tile), lambda i, r, k: (0, k)),        # x^T(src)
                pl.BlockSpec((1, tile, tile), lambda i, r, k: (r, i, k)), # counts
                pl.BlockSpec((1, fip, faug), lambda i, r, k: (r, 0, 0)),  # W_r aug
                pl.BlockSpec((1, 1, fip), lambda i, r, k: (r, 0, 0)),     # v_src
                pl.BlockSpec((fip, fop), lambda i, r, k: (0, 0)),         # W_self
                pl.BlockSpec((1, fop), lambda i, r, k: (0, 0)),           # bias
            ],
            out_specs=pl.BlockSpec((tile, fop), lambda i, r, k: (i, 0)),
            scratch_shapes=[
                pltpu.VMEM((tile, 1), jnp.float32),      # running max
                pltpu.VMEM((tile, faug), jnp.float32),   # running [acc | denom]
                pltpu.VMEM((tile, 1), jnp.float32),      # a_dst for (dst tile, rel)
            ],
        ),
        compiler_params=pltpu.CompilerParams(
            dimension_semantics=("parallel", "arbitrary", "arbitrary"),
            # plenty for these tiles; raise further (and the tile size) for large
            # graphs on v5e/v6e (128 MiB phys); keep headroom on v7x (64 MiB phys).
            vmem_limit_bytes=32 * 1024 * 1024,
        ),
    )(x_bf, x_bf, xT_bf, cnt, w_aug, v_src, w_self, b)
    return out[:n, :fout]


# ---------------------------------------------------------------------------
# Pure-JAX edge-list reference (faithful to PyG GATConv, heads=1, eval mode).
# ---------------------------------------------------------------------------
def _gat_conv_reference(x, src, dst, w, att_s, att_d, bias):
    n = x.shape[0]
    h = x @ w                                       # [N, F]   (lin, no bias)
    a_s = h @ att_s                                 # [N]
    a_d = h @ att_d                                 # [N]
    keep = src != dst                               # remove self loops, add one/node
    src = jnp.concatenate([src[keep], jnp.arange(n)])
    dst = jnp.concatenate([dst[keep], jnp.arange(n)])
    logits = jax.nn.leaky_relu(a_s[src] + a_d[dst], NEG_SLOPE)
    m = jnp.full((n,), -jnp.inf).at[dst].max(logits)
    p = jnp.exp(logits - m[dst])
    denom = jnp.zeros((n,)).at[dst].add(p)
    alpha = p / denom[dst]
    out = jnp.zeros((n, h.shape[1])).at[dst].add(alpha[:, None] * h[src])
    return out + bias


def reference_forward(x, edge_index, edge_type, params):
    num_rel = params["w_rel"].shape[0]
    x = x.astype(jnp.float32)
    x_new = x @ params["w_self"] + params["b_self"]
    for r in range(num_rel):
        er = edge_type == r
        x_new = x_new + _gat_conv_reference(
            x, edge_index[0][er], edge_index[1][er],
            params["w_rel"][r], params["att_src"][r], params["att_dst"][r],
            params["b_rel"][r])
    return x_new


# ---------------------------------------------------------------------------
if __name__ == "__main__":
    key = jax.random.PRNGKey(0)

    # RGATConv(in_features=8, out_features=32, num_relations=2); graph sized so
    # that tile=128 exercises a 2x2x2 grid (dst tiles x relations x src tiles).
    N, FIN, FOUT, NUM_REL, E = 200, 8, 32, 2, 600
    ks = jax.random.split(key, 10)

    x = jax.random.normal(ks[0], (N, FIN), jnp.float32)
    src = jax.random.randint(ks[1], (E,), 0, N)
    dst = jax.random.randint(ks[2], (E,), 0, N)
    edge_index = jnp.stack([src, dst]).astype(jnp.int32)           # [2, E]
    edge_type = jax.random.randint(ks[3], (E,), 0, NUM_REL).astype(jnp.int32)

    params = {
        "w_self":  jax.random.normal(ks[4], (FIN, FOUT), jnp.float32) * (0.2 / jnp.sqrt(1.0 * FIN)),
        "b_self":  jax.random.normal(ks[5], (FOUT,), jnp.float32) * 0.05,
        "w_rel":   jax.random.normal(ks[6], (NUM_REL, FIN, FOUT), jnp.float32) * (0.2 / jnp.sqrt(1.0 * FIN)),
        "att_src": jax.random.normal(ks[7], (NUM_REL, FOUT), jnp.float32) * 0.3,
        "att_dst": jax.random.normal(ks[8], (NUM_REL, FOUT), jnp.float32) * 0.3,
        "b_rel":   jax.random.normal(ks[9], (NUM_REL, FOUT), jnp.float32) * 0.05,
    }

    out = jax.block_until_ready(rgat_conv(x, edge_index, edge_type, params, tile=128))
    ref = reference_forward(x, edge_index, edge_type, params)

    assert out.shape == (N, FOUT)
    max_err = float(jnp.max(jnp.abs(out - ref)))
    # bf16 MXU operands (f32 accumulation) -> tolerance loosened vs the f32 path.
    assert jnp.allclose(out, ref, atol=5e-2, rtol=5e-2), max_err

    # TODO(synk): multi-head GAT (heads>1), training-mode attention dropout, and
    # edge features are not part of this module's defaults and are not implemented.
    print("KERNEL_OK")
</pallas_src>

<mosaic_0001>
module attributes {stable_mosaic.version = 11 : i64} {
  func.func @_rgat_kernel(%arg0: i32, %arg1: i32, %arg2: i32, %arg3: memref<128x16xbf16, #tpu.memory_space<vmem>>, %arg4: memref<128x16xbf16, #tpu.memory_space<vmem>>, %arg5: memref<16x128xbf16, #tpu.memory_space<vmem>>, %arg6: memref<1x128x128xbf16, #tpu.memory_space<vmem>>, %arg7: memref<1x16x128xbf16, #tpu.memory_space<vmem>>, %arg8: memref<1x1x16xbf16, #tpu.memory_space<vmem>>, %arg9: memref<16x128xbf16, #tpu.memory_space<vmem>>, %arg10: memref<1x128xf32, #tpu.memory_space<vmem>>, %arg11: memref<128x128xf32, #tpu.memory_space<vmem>>, %arg12: memref<128x1xf32, #tpu.memory_space<vmem>>, %arg13: memref<128x128xf32, #tpu.memory_space<vmem>>, %arg14: memref<128x1xf32, #tpu.memory_space<vmem>>) attributes {dimension_semantics = [#tpu.dimension_semantics<parallel>, #tpu.dimension_semantics<arbitrary>, #tpu.dimension_semantics<arbitrary>], iteration_bounds = array<i64: 2, 2, 2>, scalar_prefetch = 0 : i64, scratch_operands = 3 : i64, tpu.core_type = #tpu.core_type<tc>, window_params = [{transform_indices = @transform_0, window_bounds = array<i64: 128, 16>}, {transform_indices = @transform_1, window_bounds = array<i64: 128, 16>}, {transform_indices = @transform_2, window_bounds = array<i64: 16, 128>}, {transform_indices = @transform_3, window_bounds = array<i64: 1, 128, 128>}, {transform_indices = @transform_4, window_bounds = array<i64: 1, 16, 128>}, {transform_indices = @transform_5, window_bounds = array<i64: 1, 1, 16>}, {pipeline_mode = #tpu.pipeline_mode<synchronous>, transform_indices = @transform_6, window_bounds = array<i64: 16, 128>}, {pipeline_mode = #tpu.pipeline_mode<synchronous>, transform_indices = @transform_7, window_bounds = array<i64: 1, 128>}, {transform_indices = @transform_8, window_bounds = array<i64: 128, 128>}]} {
    %c0_i32 = arith.constant 0 : i32
    %0 = arith.cmpi eq, %arg1, %c0_i32 : i32
    %c0_i32_0 = arith.constant 0 : i32
    %1 = arith.cmpi eq, %arg2, %c0_i32_0 : i32
    %2 = arith.andi %0, %1 : i1
    %3 = arith.extui %2 : i1 to i32
    %c0_i32_1 = arith.constant 0 : i32
    %4 = arith.cmpi ne, %3, %c0_i32_1 : i32
    scf.if %4 {
      %c0_39 = arith.constant 0 : index
      %c0_40 = arith.constant 0 : index
      %60 = vector.load %arg3[%c0_39, %c0_40] : memref<128x16xbf16, #tpu.memory_space<vmem>>, vector<128x16xbf16>
      %c0_41 = arith.constant 0 : index
      %c0_42 = arith.constant 0 : index
      %61 = vector.load %arg9[%c0_41, %c0_42] : memref<16x128xbf16, #tpu.memory_space<vmem>>, vector<16x128xbf16>
      %cst_43 = arith.constant dense<0.000000e+00> : vector<128x128xf32>
      %62 = tpu.matmul %60, %61, %cst_43 {dimension_numbers = #tpu.dot_dimension_numbers<[1], [0], [0], [1], [0, 0, 1, 1], [], []>} : vector<128x16xbf16>, vector<16x128xbf16>, vector<128x128xf32> -> vector<128x128xf32>
      %c0_44 = arith.constant 0 : index
      %c0_45 = arith.constant 0 : index
      %63 = vector.load %arg11[%c0_44, %c0_45] : memref<128x128xf32, #tpu.memory_space<vmem>>, vector<128x128xf32>
      tpu.vector_store %arg11[%c0_44, %c0_45], %62 {strides = array<i32>} : memref<128x128xf32, #tpu.memory_space<vmem>>, vector<128x128xf32>,
    } else {
    }
    %c0_i32_2 = arith.constant 0 : i32
    %5 = arith.cmpi eq, %arg2, %c0_i32_2 : i32
    %6 = arith.extui %5 : i1 to i32
    %c0_i32_3 = arith.constant 0 : i32
    %7 = arith.cmpi ne, %6, %c0_i32_3 : i32
    scf.if %7 {
      %cst_39 = arith.constant -1.000000e+30 : f32
      %60 = vector.broadcast %cst_39 : f32 to vector<128x1xf32>
      %c0_40 = arith.constant 0 : index
      %c0_41 = arith.constant 0 : index
      %61 = vector.load %arg12[%c0_40, %c0_41] : memref<128x1xf32, #tpu.memory_space<vmem>>, vector<128x1xf32>
      tpu.vector_store %arg12[%c0_40, %c0_41], %60 {strides = array<i32>} : memref<128x1xf32, #tpu.memory_space<vmem>>, vector<128x1xf32>,
      %cst_42 = arith.constant 0.000000e+00 : f32
      %62 = vector.broadcast %cst_42 : f32 to vector<128x128xf32>
      %c0_43 = arith.constant 0 : index
      %c0_44 = arith.constant 0 : index
      %63 = vector.load %arg13[%c0_43, %c0_44] : memref<128x128xf32, #tpu.memory_space<vmem>>, vector<128x128xf32>
      tpu.vector_store %arg13[%c0_43, %c0_44], %62 {strides = array<i32>} : memref<128x128xf32, #tpu.memory_space<vmem>>, vector<128x128xf32>,
      %c0_45 = arith.constant 0 : index
      %c0_46 = arith.constant 0 : index
      %64 = vector.load %arg3[%c0_45, %c0_46] : memref<128x16xbf16, #tpu.memory_space<vmem>>, vector<128x16xbf16>
      %c0_47 = arith.constant 0 : index
      %c0_48 = arith.constant 0 : index
      %c0_49 = arith.constant 0 : index
      %65 = vector.load %arg7[%c0_47, %c0_48, %c0_49] : memref<1x16x128xbf16, #tpu.memory_space<vmem>>, vector<1x16x128xbf16>
      %66 = vector.shape_cast %65 : vector<1x16x128xbf16> to vector<16x128xbf16>
      %cst_50 = arith.constant dense<0.000000e+00> : vector<128x128xf32>
      %67 = tpu.matmul %64, %66, %cst_50 {dimension_numbers = #tpu.dot_dimension_numbers<[1], [0], [0], [1], [0, 0, 1, 1], [], []>} : vector<128x16xbf16>, vector<16x128xbf16>, vector<128x128xf32> -> vector<128x128xf32>
      %68 = vector.extract_strided_slice %67 {offsets = [0, 32], sizes = [128, 1], strides = [1, 1]} : vector<128x128xf32> to vector<128x1xf32>
      %c0_51 = arith.constant 0 : index
      %c0_52 = arith.constant 0 : index
      %69 = vector.load %arg14[%c0_51, %c0_52] : memref<128x1xf32, #tpu.memory_space<vmem>>, vector<128x1xf32>
      tpu.vector_store %arg14[%c0_51, %c0_52], %68 {strides = array<i32>} : memref<128x1xf32, #tpu.memory_space<vmem>>, vector<128x1xf32>,
    } else {
    }
    %c0 = arith.constant 0 : index
    %c0_4 = arith.constant 0 : index
    %8 = vector.load %arg4[%c0, %c0_4] : memref<128x16xbf16, #tpu.memory_space<vmem>>, vector<128x16xbf16>
    %c0_5 = arith.constant 0 : index
    %c0_6 = arith.constant 0 : index
    %c0_7 = arith.constant 0 : index
    %9 = vector.load %arg7[%c0_5, %c0_6, %c0_7] : memref<1x16x128xbf16, #tpu.memory_space<vmem>>, vector<1x16x128xbf16>
    %10 = vector.shape_cast %9 : vector<1x16x128xbf16> to vector<16x128xbf16>
    %cst = arith.constant dense<0.000000e+00> : vector<128x128xf32>
    %11 = tpu.matmul %8, %10, %cst {dimension_numbers = #tpu.dot_dimension_numbers<[1], [0], [0], [1], [0, 0, 1, 1], [], []>} : vector<128x16xbf16>, vector<16x128xbf16>, vector<128x128xf32> -> vector<128x128xf32>
    %c0_8 = arith.constant 0 : index
    %c0_9 = arith.constant 0 : index
    %c0_10 = arith.constant 0 : index
    %12 = vector.load %arg8[%c0_8, %c0_9, %c0_10] : memref<1x1x16xbf16, #tpu.memory_space<vmem>>, vector<1x1x16xbf16>
    %13 = vector.shape_cast %12 : vector<1x1x16xbf16> to vector<1x16xbf16>
    %c0_11 = arith.constant 0 : index
    %c0_12 = arith.constant 0 : index
    %14 = vector.load %arg5[%c0_11, %c0_12] : memref<16x128xbf16, #tpu.memory_space<vmem>>, vector<16x128xbf16>
    %cst_13 = arith.constant dense<0.000000e+00> : vector<1x128xf32>
    %15 = tpu.matmul %13, %14, %cst_13 {dimension_numbers = #tpu.dot_dimension_numbers<[1], [0], [0], [1], [0, 0, 1, 1], [], []>} : vector<1x16xbf16>, vector<16x128xbf16>, vector<1x128xf32> -> vector<1x128xf32>
    %c0_14 = arith.constant 0 : index
    %c0_15 = arith.constant 0 : index
    %16 = vector.load %arg14[%c0_14, %c0_15] : memref<128x1xf32, #tpu.memory_space<vmem>>, vector<128x1xf32>
    %17 = vector.broadcast %16 : vector<128x1xf32> to vector<128x128xf32>
    %18 = vector.broadcast %15 : vector<1x128xf32> to vector<128x128xf32>
    %19 = arith.addf %17, %18 : vector<128x128xf32>
    %cst_16 = arith.constant 0.000000e+00 : f32
    %20 = vector.broadcast %cst_16 : f32 to vector<128x128xf32>
    %21 = arith.cmpf ogt, %19, %20 : vector<128x128xf32>
    %cst_17 = arith.constant 2.000000e-01 : f32
    %22 = vector.broadcast %cst_17 : f32 to vector<128x128xf32>
    %23 = arith.mulf %22, %19 : vector<128x128xf32>
    %24 = arith.select %21, %19, %23 : vector<128x128xi1>, vector<128x128xf32>
    %c0_18 = arith.constant 0 : index
    %c0_19 = arith.constant 0 : index
    %c0_20 = arith.constant 0 : index
    %25 = vector.load %arg6[%c0_18, %c0_19, %c0_20] : memref<1x128x128xbf16, #tpu.memory_space<vmem>>, vector<1x128x128xbf16>
    %26 = vector.shape_cast %25 : vector<1x128x128xbf16> to vector<128x128xbf16>
    %27 = arith.extf %26 : vector<128x128xbf16> to vector<128x128xf32>
    %cst_21 = arith.constant 0.000000e+00 : f32
    %28 = vector.broadcast %cst_21 : f32 to vector<128x128xf32>
    %29 = arith.cmpf ogt, %27, %28 : vector<128x128xf32>
    %cst_22 = arith.constant -1.000000e+30 : f32
    %30 = vector.broadcast %cst_22 : f32 to vector<128x128xf32>
    %31 = arith.select %29, %24, %30 : vector<128x128xi1>, vector<128x128xf32>
    %c0_23 = arith.constant 0 : index
    %c0_24 = arith.constant 0 : index
    %32 = vector.load %arg12[%c0_23, %c0_24] : memref<128x1xf32, #tpu.memory_space<vmem>>, vector<128x1xf32>
    %cst_25 = arith.constant dense<0xFF800000> : vector<128xf32>
    %33 = vector.multi_reduction <maximumf>, %31, %cst_25 [1] : vector<128x128xf32> to vector<128xf32>
    %34 = vector.shape_cast %33 : vector<128xf32> to vector<128x1xf32>
    %35 = arith.maximumf %32, %34 : vector<128x1xf32>
    %c0_26 = arith.constant 0 : index
    %c0_27 = arith.constant 0 : index
    %36 = vector.load %arg12[%c0_26, %c0_27] : memref<128x1xf32, #tpu.memory_space<vmem>>, vector<128x1xf32>
    %37 = arith.subf %36, %35 : vector<128x1xf32>
    %38 = math.exp %37 : vector<128x1xf32>
    %39 = vector.broadcast %35 : vector<128x1xf32> to vector<128x128xf32>
    %40 = arith.subf %31, %39 : vector<128x128xf32>
    %41 = math.exp %40 : vector<128x128xf32>
    %42 = arith.mulf %27, %41 : vector<128x128xf32>
    %c0_28 = arith.constant 0 : index
    %c0_29 = arith.constant 0 : index
    %43 = vector.load %arg13[%c0_28, %c0_29] : memref<128x128xf32, #tpu.memory_space<vmem>>, vector<128x128xf32>
    %44 = vector.broadcast %38 : vector<128x1xf32> to vector<128x128xf32>
    %45 = arith.mulf %44, %43 : vector<128x128xf32>
    %46 = arith.truncf %42 : vector<128x128xf32> to vector<128x128xbf16>
    %47 = arith.truncf %11 : vector<128x128xf32> to vector<128x128xbf16>
    %cst_30 = arith.constant dense<0.000000e+00> : vector<128x128xf32>
    %48 = tpu.matmul %46, %47, %cst_30 {dimension_numbers = #tpu.dot_dimension_numbers<[1], [0], [0], [1], [0, 0, 1, 1], [], []>} : vector<128x128xbf16>, vector<128x128xbf16>, vector<128x128xf32> -> vector<128x128xf32>
    %49 = arith.addf %45, %48 : vector<128x128xf32>
    %c0_31 = arith.constant 0 : index
    %c0_32 = arith.constant 0 : index
    %50 = vector.load %arg13[%c0_31, %c0_32] : memref<128x128xf32, #tpu.memory_space<vmem>>, vector<128x128xf32>
    tpu.vector_store %arg13[%c0_31, %c0_32], %49 {strides = array<i32>} : memref<128x128xf32, #tpu.memory_space<vmem>>, vector<128x128xf32>,
    %c0_33 = arith.constant 0 : index
    %c0_34 = arith.constant 0 : index
    %51 = vector.load %arg12[%c0_33, %c0_34] : memref<128x1xf32, #tpu.memory_space<vmem>>, vector<128x1xf32>
    tpu.vector_store %arg12[%c0_33, %c0_34], %35 {strides = array<i32>} : memref<128x1xf32, #tpu.memory_space<vmem>>, vector<128x1xf32>,
    %c1_i32 = arith.constant 1 : i32
    %52 = arith.cmpi eq, %arg2, %c1_i32 : i32
    %53 = arith.extui %52 : i1 to i32
    %c0_i32_35 = arith.constant 0 : i32
    %54 = arith.cmpi ne, %53, %c0_i32_35 : i32
    scf.if %54 {
      %c0_39 = arith.constant 0 : index
      %c0_40 = arith.constant 0 : index
      %60 = vector.load %arg13[%c0_39, %c0_40] : memref<128x128xf32, #tpu.memory_space<vmem>>, vector<128x128xf32>
      %61 = vector.extract_strided_slice %60 {offsets = [0, 33], sizes = [128, 1], strides = [1, 1]} : vector<128x128xf32> to vector<128x1xf32>
      %62 = tpu.reciprocal %61 {approx = true} : vector<128x1xf32> -> vector<128x1xf32>
      %c0_41 = arith.constant 0 : index
      %c0_42 = arith.constant 0 : index
      %63 = vector.load %arg11[%c0_41, %c0_42] : memref<128x128xf32, #tpu.memory_space<vmem>>, vector<128x128xf32>
      %64 = vector.broadcast %62 : vector<128x1xf32> to vector<128x128xf32>
      %65 = arith.mulf %60, %64 : vector<128x128xf32>
      %66 = arith.addf %63, %65 : vector<128x128xf32>
      %c0_43 = arith.constant 0 : index
      %c0_44 = arith.constant 0 : index
      %67 = vector.load %arg11[%c0_43, %c0_44] : memref<128x128xf32, #tpu.memory_space<vmem>>, vector<128x128xf32>
      tpu.vector_store %arg11[%c0_43, %c0_44], %66 {strides = array<i32>} : memref<128x128xf32, #tpu.memory_space<vmem>>, vector<128x128xf32>,
    } else {
    }
    %c1_i32_36 = arith.constant 1 : i32
    %55 = arith.cmpi eq, %arg1, %c1_i32_36 : i32
    %c1_i32_37 = arith.constant 1 : i32
    %56 = arith.cmpi eq, %arg2, %c1_i32_37 : i32
    %57 = arith.andi %55, %56 : i1
    %58 = arith.extui %57 : i1 to i32
    %c0_i32_38 = arith.constant 0 : i32
    %59 = arith.cmpi ne, %58, %c0_i32_38 : i32
    scf.if %59 {
      %c0_39 = arith.constant 0 : index
      %c0_40 = arith.constant 0 : index
      %60 = vector.load %arg11[%c0_39, %c0_40] : memref<128x128xf32, #tpu.memory_space<vmem>>, vector<128x128xf32>
      %c0_41 = arith.constant 0 : index
      %c0_42 = arith.constant 0 : index
      %61 = vector.load %arg10[%c0_41, %c0_42] : memref<1x128xf32, #tpu.memory_space<vmem>>, vector<1x128xf32>
      %62 = vector.broadcast %61 : vector<1x128xf32> to vector<128x128xf32>
      %63 = arith.addf %60, %62 : vector<128x128xf32>
      %c0_43 = arith.constant 0 : index
      %c0_44 = arith.constant 0 : index
      %64 = vector.load %arg11[%c0_43, %c0_44] : memref<128x128xf32, #tpu.memory_space<vmem>>, vector<128x128xf32>
      tpu.vector_store %arg11[%c0_43, %c0_44], %63 {strides = array<i32>} : memref<128x128xf32, #tpu.memory_space<vmem>>, vector<128x128xf32>,
    } else {
    }
    return
  }
  func.func @transform_0(%arg0: i32, %arg1: i32, %arg2: i32) -> (i32, i32) {
    %c0_i32 = arith.constant 0 : i32
    %c0_i32_0 = arith.constant 0 : i32
    return %arg0, %c0_i32 : i32, i32
  }
  func.func @transform_1(%arg0: i32, %arg1: i32, %arg2: i32) -> (i32, i32) {
    %c0_i32 = arith.constant 0 : i32
    %c0_i32_0 = arith.constant 0 : i32
    return %arg2, %c0_i32 : i32, i32
  }
  func.func @transform_2(%arg0: i32, %arg1: i32, %arg2: i32) -> (i32, i32) {
    %c0_i32 = arith.constant 0 : i32
    %c0_i32_0 = arith.constant 0 : i32
    return %c0_i32, %arg2 : i32, i32
  }
  func.func @transform_3(%arg0: i32, %arg1: i32, %arg2: i32) -> (i32, i32, i32) {
    %c0_i32 = arith.constant 0 : i32
    return %arg1, %arg0, %arg2 : i32, i32, i32
  }
  func.func @transform_4(%arg0: i32, %arg1: i32, %arg2: i32) -> (i32, i32, i32) {
    %c0_i32 = arith.constant 0 : i32
    %c0_i32_0 = arith.constant 0 : i32
    %c0_i32_1 = arith.constant 0 : i32
    return %arg1, %c0_i32, %c0_i32_0 : i32, i32, i32
  }
  func.func @transform_5(%arg0: i32, %arg1: i32, %arg2: i32) -> (i32, i32, i32) {
    %c0_i32 = arith.constant 0 : i32
    %c0_i32_0 = arith.constant 0 : i32
    %c0_i32_1 = arith.constant 0 : i32
    return %arg1, %c0_i32, %c0_i32_0 : i32, i32, i32
  }
  func.func @transform_6(%arg0: i32, %arg1: i32, %arg2: i32) -> (i32, i32) {
    %c0_i32 = arith.constant 0 : i32
    %c0_i32_0 = arith.constant 0 : i32
    %c0_i32_1 = arith.constant 0 : i32
    return %c0_i32, %c0_i32_0 : i32, i32
  }
  func.func @transform_7(%arg0: i32, %arg1: i32, %arg2: i32) -> (i32, i32) {
    %c0_i32 = arith.constant 0 : i32
    %c0_i32_0 = arith.constant 0 : i32
    %c0_i32_1 = arith.constant 0 : i32
    return %c0_i32, %c0_i32_0 : i32, i32
  }
  func.func @transform_8(%arg0: i32, %arg1: i32, %arg2: i32) -> (i32, i32) {
    %c0_i32 = arith.constant 0 : i32
    %c0_i32_0 = arith.constant 0 : i32
    return %arg0, %c0_i32 : i32, i32
  }
}

</mosaic_0001>

<bundles_post_ra>
// kernel: tpu_custom_call.1
= control target key start
LH: loop header
LB: loop body
LE: loop exit
PB: predicated region body
PF: predicated region fallthrough
CT: control target
= control target key end

     0   :  { %s4078_s0 = inlined_call_operand.vmem [shape: bf16[256,16], index: 0, kind: input, shape index: {}]   ;;  %s4079_s1 = inlined_call_operand.vmem [shape: bf16[256,16], index: 1, kind: input, shape index: {}]   ;;  %s4080_s2 = inlined_call_operand.vmem [shape: bf16[16,256], index: 2, kind: input, shape index: {}]   ;;  %s4081_s3 = inlined_call_operand.hbm [shape: bf16[2,256,256], index: 3, kind: input, shape index: {}]   ;;  %s4082_s4 = inlined_call_operand.vmem [shape: bf16[2,16,128], index: 4, kind: input, shape index: {}]   ;;  %s4083_s5 = inlined_call_operand.vmem [shape: bf16[2,1,16], index: 5, kind: input, shape index: {}]   ;;  %s4084_s6 = inlined_call_operand.vmem [shape: bf16[16,128], index: 6, kind: input, shape index: {}]   ;;  %s4085_s7 = inlined_call_operand.vmem [shape: f32[1,128], index: 7, kind: input, shape index: {}]   ;;  %s4086_s8 = inlined_call_operand.hbm [shape: f32[256,128], index: 8, kind: output, shape index: {}]  }
   0x1   :  { %4103 = sst [smem:[#allocation25_spill]] %s4078_s0 }
   0x2   :  { %4104 = sst [smem:[#allocation26_spill]] %s4079_s1 }
   0x3   :  { %4105 = sst [smem:[#allocation27_spill]] %s4080_s2 }
   0x4   :  { %4106 = sst [smem:[#allocation28_spill]] %s4081_s3 }
   0x5   :  { %4107 = sst [smem:[#allocation29_spill]] %s4082_s4 }
   0x6   :  { %4108 = sst [smem:[#allocation30_spill]] %s4083_s5 }
   0x7   :  { %4109 = sst [smem:[#allocation31_spill]] %s4084_s6 }
   0x8   :  { %4110 = sst [smem:[#allocation32_spill]] %s4085_s7 }
   0x9   :  { %4111 = sst [smem:[#allocation33_spill]] %s4086_s8 }
   0xa   :  { %13 = vsyncpa [#allocation7], 0 }
   0xb   :  { %15 = vsyncpa [#allocation7 + $0x1], 0 }
   0xc   :  { %16 = vsyncpa [#allocation8], 0 }
   0xd   :  { %18 = vsyncpa [#allocation8 + $0x1], 0  ;;  %s3205_s27 = smov 0   ;;  %s3207_s28 = smov 0  }
   0xe   :  { %s3209_s29 = smov 0   ;;  %s3211_s30 = smov 0  }
   0xf   :  { %s3213_s9 = smov 0   ;;  %s3215_s10 = smov 0  }
  0x10   :  { %s3217_s11 = smov 0   ;;  %s3219_s12 = smov 0  }
  0x11   :  { %s3221_s13 = smov 0   ;;  %s3223_s14 = smov 0  }
  0x12   :  { %s3225_s15 = smov 0   ;;  %s3227_s16 = smov 0  }
  0x13   :  { %s3229_s17 = smov 0   ;;  %s3231_s18 = smov 0  }
  0x14   :  { %s3233_s19 = smov 0  }
  0x15 LB: > { %4112 = sst [smem:[#allocation12_spill]] %s3104_s9  ;;  %s36_s22 = sadd.s32 1, %s3132_s16  ;;  %s3144_s19 = sphi %s3233_s19, %s24_s19   ;;  %s3140_s18 = sphi %s3231_s18, %s4192_s18   ;;  %s3136_s17 = sphi %s3229_s17, %s4186_s17   ;;  %s3132_s16 = sphi %s3227_s16, %s4185_s16   ;;  %s3128_s15 = sphi %s3225_s15, %s4184_s15   ;;  %s3124_s14 = sphi %s3223_s14, %s4183_s14   ;;  %s3120_s13 = sphi %s3221_s13, %s4182_s13   ;;  %s3116_s12 = sphi %s3219_s12, %s4181_s12   ;;  %s3112_s11 = sphi %s3217_s11, %s4180_s11   ;;  %s3108_s10 = sphi %s3215_s10, %s4179_s10   ;;  %s3104_s9 = sphi %s3213_s9, %s4178_s9   ;;  %s3100_s30 = sphi %s3211_s30, %s4177_s30   ;;  %s3096_s29 = sphi %s3209_s29, %s4191_s29   ;;  %s3092_s28 = sphi %s3207_s28, %s4190_s28   ;;  %s3088_s27 = sphi %s3205_s27, %s4189_s27  }
  0x16   : > { %4113 = sst [smem:[#allocation13_spill]] %s3108_s10  ;;  %s39_s23 = sadd.s32 1, %s3136_s17 }
  0x17   : > { %4114 = sst [smem:[#allocation14_spill]] %s3116_s12  ;;  %p37_p0 = scmp.ge.s32.totalorder %s36_s22, 2 }
  0x18   : > { %4115 = sst [smem:[#allocation15_spill]] %s3124_s14  ;;  %s43_s24 = sadd.s32 1, %s3140_s18 }
  0x19   : > { %4116 = sst [smem:[#allocation16_spill]] %s3132_s16  ;;  %s102_s25 = sadd.s32 1, %s3116_s12 }
  0x1a   : > { %4117 = sst [smem:[#allocation17_spill]] %s3136_s17  ;;  %p109_p1 = scmp.ne.s32.totalorder %s3116_s12, %s3112_s11 }
  0x1b   : > { %4118 = sst [smem:[#allocation18_spill]] %s3140_s18  ;;  %s4194_s22 = smov (%p37_p0, %s36_s22), 0 }
  0x1c   : > { %4119 = sst [smem:[#allocation19_spill]] %s4194_s22  ;;  %s4196_s23 = smov (!%p37_p0, %s39_s23), %s3136_s17 }
  0x1d   : > { %s99_s26 = ssub.s32 %s3132_s16, %s4194_s22  ;;  %p110_p2 = scmp.eq.s32.totalorder %s3144_s19, 0 }
  0x1e   : > { %p41_p3 = scmp.ge.s32.totalorder %s4196_s23, 2  ;;  %p100_p4 = scmp.eq.s32.totalorder %s99_s26, 0 }
  0x1f   : > { %p3296_p5 = por %p110_p2, %p109_p1  ;;  %s132_s20 = sadd.s32 1, %s3108_s10 }
  0x20   : > { %s4198_s23 = smov (%p41_p3, %s4196_s23), 0  ;;  %s4200_s24 = smov (!%p41_p3, %s43_s24), %s3140_s18 }
  0x21   : > { %4121 = sst [smem:[#allocation20_spill]] %s4198_s23  ;;  %p45_p6 = scmp.ge.s32.totalorder %s4200_s24, 2 }
  0x22   : > { %s3305_s8 = scalar_select %p100_p4, %s3116_s12, %s102_s25  }
  0x23   : > { %s125_s22 = ssub.s32 %s3136_s17, %s4198_s23  ;;  %p139_p7 = scmp.ne.s32.totalorder %s3108_s10, %s3104_s9 }
  0x24   : > { %4122 = sst [smem:[#allocation21_spill]] %s3305_s8  ;;  %p145_p8 = scmp.ne.s32.totalorder %s3104_s9, %s3100_s30 }
  0x25   : > { %s4202_s24 = smov (%p45_p6, %s4200_s24), 0  ;;  %p3317_p9 = por %p139_p7, %p110_p2 }
  0x26   : > { %4123 = sst [smem:[#allocation22_spill]] %s4202_s24  ;;  %s4125_s25 = sadd.s32 4294967295, %s3144_s19  }
  0x27   : > { %p146_p10 = scmp.eq.s32.totalorder %s4125_s25, 0  ;;  %s126_s8 = ssub.s32 %s3140_s18, %s4202_s24 }
  0x28   : > { %s252_s6 = sadd.s32 1, %s3096_s29  ;;  %s127_s5 = sor.u32 %s126_s8, %s125_s22 }
  0x29   : > { %p3326_p11 = por %p146_p10, %p145_p8  ;;  %s129_s4 = sor.u32 %s127_s5, %s99_s26 }
  0x2a   : > { %p250_p12 = scmp.eq.s32.totalorder %s126_s8, 0  ;;  %p130_p13 = scmp.eq.s32.totalorder %s129_s4, 0 }
  0x2b   : > { %p262_p0 = scmp.ne.s32.totalorder %s3096_s29, %s3092_s28  ;;  %s4129_s0 = smov %s4125_s25 }
  0x2c   : > { %s3333_s30 = scalar_select %p250_p12, %s3096_s29, %s252_s6  }
  0x2d   : > { %s3336_s1 = scalar_select %p130_p13, %s3108_s10, %s132_s20  }
  0x2e   : > { %4127 = sst [smem:[#allocation23_spill]] %s3333_s30  ;;  %p263_p1 = scmp.eq.s32.totalorder %s4129_s0, 7 }
  0x2f   : > { %4128 = sst [smem:[#allocation24_spill]] %s3336_s1  ;;  %p268_p2 = scmp.ne.s32.totalorder %s3092_s28, %s3088_s27 }
  0x30   : > { %s4130_s14 = sadd.s32 4294967294, %s3144_s19   ;;  %p3344_p4 = por %p263_p1, %p262_p0 }
  0x31   : > { %p269_p3 = scmp.eq.s32.totalorder %s4130_s14, 7  ;;  %p2419_p7 = scmp.ge.s32.totalorder %s3144_s19, 8 }
  0x33   : > { %p3348_p6 = por %p269_p3, %p268_p2  ;;  %291 = sbr.rel (%p2419_p7) target bundleno = 86 (0x56), region = 24 }
  0x38   : > { %312 = sbr.rel (!%p3296_p5) target bundleno = 67 (0x43), region = 36  ;;  %s314_s0 = sand.u32 (%p3296_p5), 1, %s3116_s12  }
  0x39   : > { %s2421_s4 = sshll.u32 (%p3296_p5), %s3132_s16, 2  ;;  %s2420_s5 = sshll.u32 (%p3296_p5), %s314_s0, 3 }
  0x3a   : > { %s4133_s2 = sld [smem:[#allocation27_spill]] (%p3296_p5)  ;;  %s316_s20 = scalar_lea.vmem (%p3296_p5), [#allocation5], %s2420_s5 }
  0x40   : > { %s318_s14 = scalar_lea.vmem %s4133_s2, %s2421_s4 }
  0x41   : > { %v335_v0 = vld [vmem:[%s318_s14] sm:$0xf]  ;;  %v337_v1 = vld [vmem:[%s318_s14 + $0x8] sm:$0xf] }
  0x42   : > { %336 = vst [vmem:[%s316_s20] sm:$0xf] %v335_v0  ;;  %338 = vst [vmem:[%s316_s20 + $0x4] sm:$0xf] %v337_v1 }
  0x43 PF: > { %s367_s21 = sand.u32 1, %s3108_s10   ;;  %s2498_s26 = sshll.u32 %s3140_s18, 5 }
  0x44   : > { %s2422_s24 = sshll.u32 %s367_s21, 6  ;;  %s377_s12 = sadd.s32 %s3132_s16, %s2498_s26 }
  0x45   : > { %s2425_s0 = sshll.u32 %s3136_s17, 6  ;;  %s371_s1 = scalar_lea.vmem [#allocation6], %s2422_s24 }
  0x46   : > { %s382_s30 = sshll.u32 %s371_s1, 4  ;;  %s379_s6 = sadd.s32 %s2425_s0, %s377_s12  ;;  %s383_s30 = int_to_ptr.vmem [resolvable:$true] %s382_s30 }
  0x47   : > { %s2426_s4 = sshll.u32 %s379_s6, 6  ;;  %s4134_s3 = sld [smem:[#allocation28_spill]] }
  0x48   : > { %s368_s20 = scalar_lea.sflag [#allocation7], %s367_s21  ;;  %s2978_s2 = scalar_lea.vmem %s383_s30, 1024 }
  0x49   : > { %p2979_p5 = scmp.ne.s32.totalorder %s383_s30, %s2978_s2  ;;  %s3146_s10 = smov [#allocation6]  }
  0x4a   : > { %s2982_s18 = sshll.u32 %s3146_s10, 4  ;;  %s2983_s18 = int_to_ptr.vmem [resolvable:$false] %s2982_s18 }
  0x4b   : > { %p2980_p8 = pnand %p2979_p5, %p3317_p9  ;;  %s2984_s26 = scalar_lea.vmem %s2983_s18, 2048 }
  0x4c   : > { %p2985_p12 = scmp.lt.s32.totalorder %s383_s30, %s2983_s18  ;;  %p2986_p13 = scmp.lt.s32.totalorder %s2984_s26, %s2978_s2 }
  0x4d   : > { %s381_s14 = scalar_lea.hbm %s4134_s3, %s2426_s4  ;;  %p2981_p10 = pneg %p2980_p8 }
  0x4e   : > { %p2987_p0 = por %p2986_p13, %p2985_p12 }
  0x50   : > { %p2988_p1 = pnand %p2987_p0, %p2981_p10 }
  0x52   : > { %2991 = shalt.err (!%p2988_p1)
}
  0x53   : > { %s3147_s1 = smov 128   ;;  %s3148_s12 = smov 64  }
  0x54   : > { %s3149_s24 = smov 4  }
  0x55   : > { %2697 = dma.hbm_to_vmem [thread:$0]  (%p3317_p9), %s381_s14, 1024, %s383_s30, %s368_s20, %s3147_s1, %s3148_s12, %s3149_s24  }
  0x56 PF: > { %p2427_p2 = scmp.ge.s32.totalorder %s3144_s19, 1  ;;  %p404_p3 = scmp.lt.s32.totalorder %s3144_s19, 9 }
  0x58   : > { %p405_p7 = pnand %p2427_p2, %p404_p3 }
  0x59   : > { %s411_s2 = sand.u32 (!%p405_p7), 1, %s3112_s11   ;;  %s417_s10 = sand.u32 (!%p405_p7), 1, %s3104_s9  }
  0x5a   : > { %408 = sbr.rel (%p405_p7) target bundleno = 1627 (0x65b), region = 89  ;;  %s3375_s18 = sshll.u32 (!%p405_p7), %s411_s2, 3 }
  0x5b   : > { %s2429_s21 = sshll.u32 (!%p405_p7), %s417_s10, 6  ;;  %s418_s6 = scalar_lea.sflag (!%p405_p7), [#allocation7], %s417_s10 }
  0x5c   : > { %s3378_s7 = scalar_lea.vmem (!%p405_p7), [#allocation6], %s2429_s21 }
  0x5f   : > { %3079 = dma.done.wait (%p3326_p11), %s418_s6, 1024  }
  0x60   : > { %3081 = vsyncadd (%p3326_p11), %s418_s6, 4294966272  ;;  %s4135_s30 = sld [smem:[#allocation15_spill]]  ;;  %s4095_s11 = sand.u32 1, %s3092_s28  }
  0x61   : > { %s2431_s4 = sshll.u32 %s3128_s15, 4  ;;  %s2430_s8 = sshll.u32 %s4095_s11, 7 }
  0x62   : > { %p477_p9 = scmp.lt.s32.totalorder %s2431_s4, 31  ;;  %s2433_s5 = sshll.u32 %s3120_s13, 4 }
  0x63   : > { %p483_p5 = scmp.lt.s32.totalorder %s2433_s5, 31  ;;  %s4136_s26 = sld [smem:[#allocation25_spill]] }
  0x64   : > { %s4204_s4 = smov (!%p477_p9, %s2431_s4), 31  ;;  %p500_p11 = scmp.eq.s32.totalorder %s3120_s13, 0 }
  0x65   : > { %s2432_s14 = sshll.u32 %s4204_s4, 2  ;;  %s4206_s5 = smov (!%p483_p5, %s2433_s5), 31 }
  0x66   : > { %p489_p8 = scmp.lt.s32.totalorder %s4135_s30, 1  ;;  %p499_p10 = scmp.eq.s32.totalorder %s4135_s30, 0 }
  0x67   : > { %s2434_s12 = sshll.u32 %s4206_s5, 2  ;;  %s4137_s10 = sld [smem:[#allocation26_spill]] }
  0x68   : > { %s4208_s30 = smov (!%p489_p8, %s4135_s30), 1  ;;  %p501_p12 = pnand %p500_p11, %p499_p10 }
  0x69   : > { %s3394_s1 = scalar_lea.vmem %s4136_s26, %s2432_s14  ;;  %s2499_s6 = sshll.u32 %s4208_s30, 3 }
  0x6a   : > { %s4138_s0 = sld [smem:[#allocation29_spill]]  ;;  %s3415_s17 = scalar_lea.vmem [#allocation9], %s2430_s8 }
  0x6b   : > { %s4139_s26 = sld [smem:[#allocation30_spill]] }
  0x6c   : > { %s4140_s9 = sld [smem:[#allocation31_spill]] (!%p501_p12) }
  0x6d   : > { %s3403_s21 = scalar_lea.vmem %s4137_s10, %s2434_s12  ;;  %504 = sbr.rel (%p501_p12) target bundleno = 327 (0x147), region = 101 }
  0x70   : > { %s3409_s23 = scalar_lea.vmem %s4138_s0, %s2499_s6 }
  0x71   : > { %s496_s3 = scalar_lea.vmem %s4139_s26, %s4208_s30 }
  0x72   : > { %v2838_v2 = vld [vmem:[%s4140_s9] sm:$0xff]   ;;  %vm569_vm0 = vcmask 130048   ;;  %v2841_v5 = vld [vmem:[%s3394_s1 + $0x8] sm:$0xff]   ;;  %v2843_v7 = vld [vmem:[%s3394_s1 + $0x10] sm:$0xff]  }
  0x73   : > { %v2839_v3 = vld [vmem:[%s3394_s1] sm:$0xff]   ;;  %2585 = vmatprep.subr.bf16.mxu0 %v2838_v2  ;;  %2677 = vmatprep.subr.bf16.mxu1 %v2838_v2  ;;  %v2842_v6 = vld [vmem:[%s3394_s1 + $0x28] sm:$0xff]   ;;  %v2844_v8 = vld [vmem:[%s3394_s1 + $0x30] sm:$0xff]  }
  0x74   : > { %v2840_v4 = vld [vmem:[%s3394_s1 + $0x20] sm:$0xff]   ;;  %2586 = vmatpush3.bf16.msra.mxu0 %v2838_v2  ;;  %2678 = vmatpush3.bf16.msra.mxu1 %v2838_v2  ;;  %v2845_v9 = vld [vmem:[%s3394_s1 + $0x18] sm:$0xff]  }
  0x75   : > { %2587 = vmatprep.mubr.msk.bf16.mxu0 %vm569_vm0, %v2839_v3  ;;  %2595 = vmatprep.mubr.msk.bf16.mxu1 %vm569_vm0, %v2840_v4  ;;  %v2846_v10 = vld [vmem:[%s3394_s1 + $0x38] sm:$0xff]  }
  0x77   : > { %2588 = vmatmul.mubr.msk.bf16.vlgmr.msra.gmra.mxu0 %vm569_vm0, %v2841_v5  ;;  %2596 = vmatmul.mubr.msk.bf16.vlgmr.msra.gmra.mxu1 %vm569_vm0, %v2842_v6 }
  0x78   : > { %2591 = vmatprep.mubr.msk.bf16.mxu0 %vm569_vm0, %v2843_v7  ;;  %2599 = vmatprep.mubr.msk.bf16.mxu1 %vm569_vm0, %v2844_v8 }
  0x7f   : > { %2592 = vmatmul.mubr.msk.bf16.gmra.mxu0 %vm569_vm0, %v2845_v9  ;;  %2600 = vmatmul.mubr.msk.bf16.gmra.mxu1 %vm569_vm0, %v2846_v10 }
 0x137   : > { %v2589_v11 = vpop.f32.mrf.mxu0  ;;  %v2597_v12 = vpop.f32.mrf.mxu1 }
 0x138   : > { %693 = vst [vmem:[%s3415_s17 + $0x10] sm:$0xff] %v2589_v11  ;;  %701 = vst [vmem:[%s3415_s17 + $0x50] sm:$0xff] %v2597_v12 }
 0x139   : > { %v628_v13 = vpop.f32.mrf.mxu0  ;;  %v660_v14 = vpop.f32.mrf.mxu1 }
 0x13a   : > { %691 = vst [vmem:[%s3415_s17] sm:$0xff] %v628_v13  ;;  %699 = vst [vmem:[%s3415_s17 + $0x40] sm:$0xff] %v660_v14 }
 0x13b   : > { %v2590_v15 = vpop.f32.mrf.mxu0  ;;  %v2598_v16 = vpop.f32.mrf.mxu1 }
 0x13c   : > { %694 = vst [vmem:[%s3415_s17 + $0x18] sm:$0xff] %v2590_v15  ;;  %702 = vst [vmem:[%s3415_s17 + $0x58] sm:$0xff] %v2598_v16 }
 0x13d   : > { %v631_v17 = vpop.f32.mrf.mxu0  ;;  %v663_v18 = vpop.f32.mrf.mxu1 }
 0x13e   : > { %692 = vst [vmem:[%s3415_s17 + $0x8] sm:$0xff] %v631_v17  ;;  %700 = vst [vmem:[%s3415_s17 + $0x48] sm:$0xff] %v663_v18 }
 0x13f   : > { %v2593_v19 = vpop.f32.mrf.mxu0  ;;  %v2601_v20 = vpop.f32.mrf.mxu1 }
 0x140   : > { %697 = vst [vmem:[%s3415_s17 + $0x30] sm:$0xff] %v2593_v19  ;;  %705 = vst [vmem:[%s3415_s17 + $0x70] sm:$0xff] %v2601_v20 }
 0x141   : > { %v644_v21 = vpop.f32.mrf.mxu0  ;;  %v676_v22 = vpop.f32.mrf.mxu1 }
 0x142   : > { %695 = vst [vmem:[%s3415_s17 + $0x20] sm:$0xff] %v644_v21  ;;  %703 = vst [vmem:[%s3415_s17 + $0x60] sm:$0xff] %v676_v22 }
 0x143   : > { %v2594_v23 = vpop.f32.mrf.mxu0  ;;  %v2602_v24 = vpop.f32.mrf.mxu1 }
 0x144   : > { %698 = vst [vmem:[%s3415_s17 + $0x38] sm:$0xff] %v2594_v23  ;;  %706 = vst [vmem:[%s3415_s17 + $0x78] sm:$0xff] %v2602_v24 }
 0x145   : > { %v647_v25 = vpop.f32.mrf.mxu0  ;;  %v679_v26 = vpop.f32.mrf.mxu1 }
 0x146   : > { %696 = vst [vmem:[%s3415_s17 + $0x28] sm:$0xff] %v647_v25  ;;  %704 = vst [vmem:[%s3415_s17 + $0x68] sm:$0xff] %v679_v26 }
 0x147 PF: > { %p2454_p13 = scmp.ne.s32.totalorder %s3120_s13, 0 }
 0x148   : > { %s3152_s9 = smov (!%p2454_p13), 96  }
 0x149   : > { %709 = sbr.rel (%p2454_p13) target bundleno = 676 (0x2a4), region = 105 }
 0x14e   : > { %v2847_v27 = vld [vmem:[%s3409_s23] sm:$0xff]   ;;  %v3150_v28 = vmov 0.0   ;;  %vm807_vm1 = vcmask 130048   ;;  %v2850_v31 = vld [vmem:[%s3394_s1 + $0x8] sm:$0xff]   ;;  %v2852_v33 = vld [vmem:[%s3394_s1 + $0x10] sm:$0xff]   ;;  %vm710_vm2 = vcmask 7168  }
 0x14f   : > { %727 = vst [vmem:[#allocation3 + $0x30] sm:$0xff] %v3150_v28  ;;  %728 = vst [vmem:[#allocation3] sm:$0xff] %v3150_v28  ;;  %v2848_v29 = vld [vmem:[%s3394_s1] sm:$0xff]   ;;  %2603 = vmatprep.subr.bf16.mxu0 %v2847_v27  ;;  %2679 = vmatprep.subr.bf16.mxu1 %v2847_v27  ;;  %v2851_v32 = vld [vmem:[%s3394_s1 + $0x28] sm:$0xff]   ;;  %v3151_v37 = vmov -1e+30  }
 0x150   : > { %729 = vst [vmem:[#allocation3 + $0x58] sm:$0xff] %v3150_v28  ;;  %730 = vst [vmem:[#allocation3 + $0x18] sm:$0xff] %v3150_v28  ;;  %v2849_v30 = vld [vmem:[%s3394_s1 + $0x20] sm:$0xff]   ;;  %2604 = vmatpush3.bf16.msra.mxu0 %v2847_v27  ;;  %2680 = vmatpush3.bf16.msra.mxu1 %v2847_v27  ;;  %v2854_v34 = vld [vmem:[%s3394_s1 + $0x30] sm:$0xff]  }
 0x151   : > { %731 = vst [vmem:[#allocation3 + $0x50] sm:$0xff] %v3150_v28  ;;  %732 = vst [vmem:[#allocation3 + $0x68] sm:$0xff] %v3150_v28  ;;  %2605 = vmatprep.mubr.msk.bf16.mxu0 %vm807_vm1, %v2848_v29  ;;  %2613 = vmatprep.mubr.msk.bf16.mxu1 %vm807_vm1, %v2849_v30  ;;  %v2853_v35 = vld [vmem:[%s3394_s1 + $0x18] sm:$0xff]  }
 0x152   : > { %733 = vst [vmem:[#allocation3 + $0x8] sm:$0xff] %v3150_v28  ;;  %734 = vst [vmem:[#allocation3 + $0x48] sm:$0xff] %v3150_v28  ;;  %v2855_v36 = vld [vmem:[%s3394_s1 + $0x38] sm:$0xff]  }
 0x153   : > { %735 = vst [vmem:[#allocation3 + $0x40] sm:$0xff] %v3150_v28  ;;  %736 = vst [vmem:[#allocation3 + $0x20] sm:$0xff] %v3150_v28  ;;  %2606 = vmatmul.mubr.msk.bf16.vlgmr.msra.gmra.mxu0 %vm807_vm1, %v2850_v31  ;;  %2614 = vmatmul.mubr.msk.bf16.vlgmr.msra.gmra.mxu1 %vm807_vm1, %v2851_v32 }
 0x154   : > { %737 = vst [vmem:[#allocation3 + $0x10] sm:$0xff] %v3150_v28  ;;  %738 = vst [vmem:[#allocation3 + $0x38] sm:$0xff] %v3150_v28  ;;  %2609 = vmatprep.mubr.msk.bf16.mxu0 %vm807_vm1, %v2852_v33  ;;  %2617 = vmatprep.mubr.msk.bf16.mxu1 %vm807_vm1, %v2854_v34 }
 0x155   : > { %739 = vst [vmem:[#allocation3 + $0x60] sm:$0xff] %v3150_v28  ;;  %740 = vst [vmem:[#allocation3 + $0x70] sm:$0xff] %v3150_v28 }
 0x156   : > { %741 = vst [vmem:[#allocation3 + $0x78] sm:$0xff] %v3150_v28  ;;  %742 = vst [vmem:[#allocation3 + $0x28] sm:$0xff] %v3150_v28 }
 0x157   : > { %711 = vst.msk [vmem:[#allocation2] sm:$0xff] %vm710_vm2, %v3151_v37  ;;  %712 = vst.msk [vmem:[#allocation2 + $0x8] sm:$0xff] %vm710_vm2, %v3151_v37 }
 0x158   : > { %713 = vst.msk [vmem:[#allocation2 + $0x10] sm:$0xff] %vm710_vm2, %v3151_v37  ;;  %714 = vst.msk [vmem:[#allocation2 + $0x18] sm:$0xff] %vm710_vm2, %v3151_v37 }
 0x159   : > { %715 = vst.msk [vmem:[#allocation2 + $0x20] sm:$0xff] %vm710_vm2, %v3151_v37  ;;  %716 = vst.msk [vmem:[#allocation2 + $0x28] sm:$0xff] %vm710_vm2, %v3151_v37 }
 0x15a   : > { %717 = vst.msk [vmem:[#allocation2 + $0x30] sm:$0xff] %vm710_vm2, %v3151_v37  ;;  %718 = vst.msk [vmem:[#allocation2 + $0x38] sm:$0xff] %vm710_vm2, %v3151_v37 }
 0x15b   : > { %2610 = vmatmul.mubr.msk.bf16.gmra.mxu0 %vm807_vm1, %v2853_v35  ;;  %2618 = vmatmul.mubr.msk.bf16.gmra.mxu1 %vm807_vm1, %v2855_v36  ;;  %719 = vst.msk [vmem:[#allocation2 + $0x40] sm:$0xff] %vm710_vm2, %v3151_v37  ;;  %720 = vst.msk [vmem:[#allocation2 + $0x48] sm:$0xff] %vm710_vm2, %v3151_v37 }
 0x15c   : > { %721 = vst.msk [vmem:[#allocation2 + $0x50] sm:$0xff] %vm710_vm2, %v3151_v37  ;;  %722 = vst.msk [vmem:[#allocation2 + $0x58] sm:$0xff] %vm710_vm2, %v3151_v37 }
 0x15d   : > { %723 = vst.msk [vmem:[#allocation2 + $0x60] sm:$0xff] %vm710_vm2, %v3151_v37  ;;  %724 = vst.msk [vmem:[#allocation2 + $0x68] sm:$0xff] %vm710_vm2, %v3151_v37 }
 0x15e   : > { %725 = vst.msk [vmem:[#allocation2 + $0x70] sm:$0xff] %vm710_vm2, %v3151_v37  ;;  %726 = vst.msk [vmem:[#allocation2 + $0x78] sm:$0xff] %vm710_vm2, %v3151_v37 }
 0x213   : > { %v2607_v38 = vpop.f32.mrf.mxu0  ;;  %v2615_v39 = vpop.f32.mrf.mxu1 }
 0x214   : > { %965 = vrot.lane.b32.xlu0 %v2615_v39, %s3152_s9  ;;  %949 = vrot.lane.b32.xlu1 %v2607_v38, %s3152_s9 }
 0x215   : > { %v866_v40 = vpop.f32.mrf.mxu0  ;;  %v898_v41 = vpop.f32.mrf.mxu1 }
 0x217   : > { %v2608_v42 = vpop.f32.mrf.mxu0  ;;  %v2616_v43 = vpop.f32.mrf.mxu1 }
 0x218   : > { %945 = vrot.lane.b32.xlu0 %v866_v40, %s3152_s9  ;;  %951 = vrot.lane.b32.xlu1 %v2608_v42, %s3152_s9 }
 0x219   : > { %v869_v44 = vpop.f32.mrf.mxu0  ;;  %v901_v46 = vpop.f32.mrf.mxu1 }
 0x21b   : > { %v2611_v45 = vpop.f32.mrf.mxu0  ;;  %v2619_v48 = vpop.f32.mrf.mxu1 }
 0x21c   : > { %961 = vrot.lane.b32.xlu0 %v898_v41, %s3152_s9  ;;  %967 = vrot.lane.b32.xlu1 %v2616_v43, %s3152_s9 }
 0x21d   : > { %v882_v47 = vpop.f32.mrf.mxu0  ;;  %v914_v50 = vpop.f32.mrf.mxu1 }
 0x21f   : > { %v2612_v49 = vpop.f32.mrf.mxu0  ;;  %v2620_v52 = vpop.f32.mrf.mxu1 }
 0x220   : > { %963 = vrot.lane.b32.xlu1 %v901_v46, %s3152_s9  ;;  %947 = vrot.lane.b32.xlu0 %v869_v44, %s3152_s9 }
 0x221   : > { %v885_v51 = vpop.f32.mrf.mxu0  ;;  %v917_v53 = vpop.f32.mrf.mxu1 }
 0x224   : > { %957 = vrot.lane.b32.xlu0 %v2611_v45, %s3152_s9  ;;  %959 = vrot.lane.b32.xlu1 %v2612_v49, %s3152_s9 }
 0x228   : > { %953 = vrot.lane.b32.xlu0 %v882_v47, %s3152_s9  ;;  %955 = vrot.lane.b32.xlu1 %v885_v51, %s3152_s9 }
 0x22c   : > { %969 = vrot.lane.b32.xlu0 %v914_v50, %s3152_s9  ;;  %971 = vrot.lane.b32.xlu1 %v917_v53, %s3152_s9 }
 0x230   : > { %973 = vrot.lane.b32.xlu0 %v2619_v48, %s3152_s9  ;;  %975 = vrot.lane.b32.xlu1 %v2620_v52, %s3152_s9 }
 0x286   : > { %v966_v54 = vpop.permute.xlu0 %965  ;;  %v950_v55 = vpop.permute.xlu1 %949 }
 0x287   : > { %1003 = vst.msk [vmem:[#allocation4 + $0x50] sm:$0xff] %vm710_vm2, %v966_v54  ;;  %995 = vst.msk [vmem:[#allocation4 + $0x10] sm:$0xff] %vm710_vm2, %v950_v55 }
 0x28a   : > { %v946_v56 = vpop.permute.xlu0 %945  ;;  %v952_v57 = vpop.permute.xlu1 %951 }
 0x28b   : > { %993 = vst.msk [vmem:[#allocation4] sm:$0xff] %vm710_vm2, %v946_v56  ;;  %996 = vst.msk [vmem:[#allocation4 + $0x18] sm:$0xff] %vm710_vm2, %v952_v57 }
 0x28e   : > { %v962_v58 = vpop.permute.xlu0 %961  ;;  %v968_v59 = vpop.permute.xlu1 %967 }
 0x28f   : > { %1001 = vst.msk [vmem:[#allocation4 + $0x40] sm:$0xff] %vm710_vm2, %v962_v58  ;;  %1004 = vst.msk [vmem:[#allocation4 + $0x58] sm:$0xff] %vm710_vm2, %v968_v59 }
 0x292   : > { %v964_v60 = vpop.permute.xlu1 %963  ;;  %v948_v61 = vpop.permute.xlu0 %947 }
 0x293   : > { %1002 = vst.msk [vmem:[#allocation4 + $0x48] sm:$0xff] %vm710_vm2, %v964_v60  ;;  %994 = vst.msk [vmem:[#allocation4 + $0x8] sm:$0xff] %vm710_vm2, %v948_v61 }
 0x296   : > { %v958_v62 = vpop.permute.xlu0 %957  ;;  %v960_v63 = vpop.permute.xlu1 %959 }
 0x297   : > { %999 = vst.msk [vmem:[#allocation4 + $0x30] sm:$0xff] %vm710_vm2, %v958_v62  ;;  %1000 = vst.msk [vmem:[#allocation4 + $0x38] sm:$0xff] %vm710_vm2, %v960_v63 }
 0x29a   : > { %v954_v0 = vpop.permute.xlu0 %953  ;;  %v956_v1 = vpop.permute.xlu1 %955 }
 0x29b   : > { %997 = vst.msk [vmem:[#allocation4 + $0x20] sm:$0xff] %vm710_vm2, %v954_v0  ;;  %998 = vst.msk [vmem:[#allocation4 + $0x28] sm:$0xff] %vm710_vm2, %v956_v1 }
 0x29e   : > { %v970_v2 = vpop.permute.xlu0 %969  ;;  %v972_v3 = vpop.permute.xlu1 %971 }
 0x29f   : > { %1005 = vst.msk [vmem:[#allocation4 + $0x60] sm:$0xff] %vm710_vm2, %v970_v2  ;;  %1006 = vst.msk [vmem:[#allocation4 + $0x68] sm:$0xff] %vm710_vm2, %v972_v3 }
 0x2a2   : > { %v974_v4 = vpop.permute.xlu0 %973  ;;  %v976_v5 = vpop.permute.xlu1 %975 }
 0x2a3   : > { %1007 = vst.msk [vmem:[#allocation4 + $0x70] sm:$0xff] %vm710_vm2, %v974_v4  ;;  %1008 = vst.msk [vmem:[#allocation4 + $0x78] sm:$0xff] %vm710_vm2, %v976_v5 }
 0x2a4 PF: > { %s4141_s16 = scalar_lea.vmem [#allocation5], %s3375_s18  ;;  %v3153_v7 = vmov 0.0   ;;  %v1255_v8 = vld [vmem:[#allocation4 + $0x40] sm:$0xff]  ;;  %vm3154_vm3 = vmmov 0   ;;  %vm1073_vm4 = vcmask 130048   ;;  %v3155_v11 = vmov 0  }
 0x2a5   : > { %v2858_v6 = vld [vmem:[%s4141_s16] sm:$0xff]   ;;  %2639 = vmatprep.subr.bf16.mxu1 %v3153_v7  ;;  %2641 = vmatprep.mubr.msk.bf16.mxu1 %vm3154_vm3, %v3153_v7  ;;  %v1250_v14 = vld [vmem:[#allocation4 + $0x18] sm:$0xff]  ;;  %v1249_v15 = vld [vmem:[#allocation4 + $0x10] sm:$0xff]  ;;  %v1343_v39 = vlaneseq  ;;  %p2005_p0 = scmp.eq.s32.totalorder %s3120_s13, 1  ;;  %p2491_p1 = scmp.ne.s32.totalorder %s3120_s13, 1 }
 0x2a6   : > { %2640 = vmatpush3.bf16.msra.mxu1 %v2858_v6  ;;  %v1195_v9 = vld [vmem:[%s496_s3] sm:$0x1]  ;;  %2857 = vset.pattern.permute.xlu1 %v3155_v11  ;;  %v1256_v12 = vld [vmem:[#allocation4 + $0x48] sm:$0xff]  ;;  %v1258_v16 = vld [vmem:[#allocation4 + $0x58] sm:$0xff] }
 0x2a7   : > { %v1247_v10 = vld [vmem:[#allocation4] sm:$0xff]  ;;  %2856 = vset.pattern.permute.xlu0 %v3155_v11  ;;  %1305 = vperm.xlu1 %2857, %v1255_v8   ;;  %v1248_v13 = vld [vmem:[#allocation4 + $0x8] sm:$0xff]  ;;  %v1257_v17 = vld [vmem:[#allocation4 + $0x50] sm:$0xff]  ;;  %v1344_v41 = vshrl.u32 %v1343_v39, 7 }
 0x2a8   : > { %1265 = vperm.xlu0 %2856, %v1247_v10   ;;  %v1252_v18 = vld [vmem:[#allocation4 + $0x28] sm:$0xff]  ;;  %v1251_v19 = vld [vmem:[#allocation4 + $0x20] sm:$0xff]  ;;  %v1254_v22 = vld [vmem:[#allocation4 + $0x38] sm:$0xff] }
 0x2a9   : > { %2642 = vmatmul.mubr.msk.bf16.vlgmr.msra.gmra.mxu1 %vm1073_vm4, %v1195_v9  ;;  %v1260_v20 = vld [vmem:[#allocation4 + $0x68] sm:$0xff]  ;;  %v1259_v21 = vld [vmem:[#allocation4 + $0x60] sm:$0xff]  ;;  %v1253_v23 = vld [vmem:[#allocation4 + $0x30] sm:$0xff]  ;;  %v1345_v45 = vsub.s32 0, %v1344_v41 }
 0x2aa   : > { %v1262_v24 = vld [vmem:[#allocation4 + $0x78] sm:$0xff]  ;;  %v1261_v25 = vld [vmem:[#allocation4 + $0x70] sm:$0xff]  ;;  %v2859_v26 = vld [vmem:[%s3409_s23] sm:$0xff]  }
 0x2ab   : > { %1310 = vperm.xlu1 %2857, %v1256_v12   ;;  %2621 = vmatprep.subr.bf16.mxu0 %v2859_v26  ;;  %v2860_v27 = vld [vmem:[%s3403_s21] sm:$0xff]   ;;  %v2861_v28 = vld [vmem:[%s3403_s21 + $0x8] sm:$0xff]   ;;  %v2862_v29 = vld [vmem:[%s3403_s21 + $0x10] sm:$0xff]  }
 0x2ac   : > { %1270 = vperm.xlu0 %2856, %v1248_v13   ;;  %2622 = vmatpush3.bf16.msra.mxu0 %v2859_v26  ;;  %v2863_v30 = vld [vmem:[%s3403_s21 + $0x18] sm:$0xff]   ;;  %v2864_v31 = vld [vmem:[%s3403_s21 + $0x20] sm:$0xff]   ;;  %v2865_v32 = vld [vmem:[%s3403_s21 + $0x28] sm:$0xff]  }
 0x2ad   : > { %2623 = vmatprep.mubr.msk.bf16.mxu0 %vm1073_vm4, %v2860_v27  ;;  %v2866_v33 = vld [vmem:[%s3403_s21 + $0x30] sm:$0xff]   ;;  %v2867_v34 = vld [vmem:[%s3403_s21 + $0x38] sm:$0xff]  }
 0x2ae   : > { %v3528_v43 = vld [vmem:[%s3378_s7] sm:$0xff]   ;;  %v3532_v47 = vld [vmem:[%s3378_s7 + $0x8] sm:$0xff]  }
 0x2af   : > { %1280 = vperm.xlu1 %2857, %v1250_v14   ;;  %2624 = vmatmul.mubr.msk.bf16.vlgmr.msra.gmra.mxu0 %vm1073_vm4, %v2861_v28  ;;  %v2504_v46 = vunpack.c.h.bf16 %v3528_v43  ;;  %v2503_v50 = vunpack.c.l.bf16 %v3528_v43  ;;  %v3536_v51 = vld [vmem:[%s3378_s7 + $0x20] sm:$0xff]   ;;  %v2507_v54 = vunpack.c.l.bf16 %v3532_v47  ;;  %v3542_v55 = vld [vmem:[%s3378_s7 + $0x28] sm:$0xff]  }
 0x2b0   : > { %1275 = vperm.xlu0 %2856, %v1249_v15   ;;  %2627 = vmatprep.mubr.msk.bf16.mxu0 %vm1073_vm4, %v2862_v29  ;;  %v2519_v60 = vunpack.c.l.bf16 %v3536_v51  ;;  %v2523_v2 = vunpack.c.l.bf16 %v3542_v55  ;;  %v2520_v9 = vunpack.c.h.bf16 %v3536_v51  ;;  %v2508_v29 = vunpack.c.h.bf16 %v3532_v47 }
 0x2b1   : > { %vm3547_vm5 = vcmp.gt.f32.partialorder %v2504_v46, 0.0  ;;  %vm3555_vm6 = vcmp.gt.f32.partialorder %v2503_v50, 0.0  ;;  %vm3566_vm9 = vcmp.gt.f32.partialorder %v2507_v54, 0.0 }
 0x2b2   : > { %vm3573_vm12 = vcmp.gt.f32.partialorder %v2519_v60, 0.0  ;;  %vm3594_vm15 = vcmp.gt.f32.partialorder %v2523_v2, 0.0  ;;  %vm3600_vm0 = vcmp.gt.f32.partialorder %v2520_v9, 0.0 }
 0x2b3   : > { %1320 = vperm.xlu1 %2857, %v1258_v16   ;;  %v3578_v16 = vld [vmem:[%s3378_s7 + $0x10] sm:$0xff]  }
 0x2b4   : > { %1315 = vperm.xlu0 %2856, %v1257_v17   ;;  %v2511_v28 = vunpack.c.l.bf16 %v3578_v16 }
 0x2b6   : > { %vm3623_vm3 = vcmp.gt.f32.partialorder %v2511_v28, 0.0 }
 0x2b7   : > { %1290 = vperm.xlu1 %2857, %v1252_v18   ;;  %2628 = vmatmul.mubr.msk.bf16.gmra.mxu0 %vm1073_vm4, %v2863_v30 }
 0x2b8   : > { %1285 = vperm.xlu0 %2856, %v1251_v19   ;;  %2631 = vmatprep.mubr.msk.bf16.mxu0 %vm1073_vm4, %v2864_v31 }
 0x2bb   : > { %1330 = vperm.xlu1 %2857, %v1260_v20  }
 0x2bc   : > { %1325 = vperm.xlu0 %2856, %v1259_v21  }
 0x2bf   : > { %1300 = vperm.xlu1 %2857, %v1254_v22   ;;  %2632 = vmatmul.mubr.msk.bf16.gmra.mxu0 %vm1073_vm4, %v2865_v32 }
 0x2c0   : > { %1295 = vperm.xlu0 %2856, %v1253_v23   ;;  %2635 = vmatprep.mubr.msk.bf16.mxu0 %vm1073_vm4, %v2866_v33 }
 0x2c3   : > { %1340 = vperm.xlu1 %2857, %v1262_v24  }
 0x2c4   : > { %1335 = vperm.xlu0 %2856, %v1261_v25  }
 0x2c7   : > { %2636 = vmatmul.mubr.msk.bf16.gmra.mxu0 %vm1073_vm4, %v2867_v34  ;;  %v3615_v34 = vld [vmem:[%s3378_s7 + $0x30] sm:$0xff]   ;;  %vm3629_vm4 = vcmp.gt.f32.partialorder %v2508_v29, 0.0 }
 0x322   : > { %v1306_v37 = vpop.permute.xlu1 %1305 }
 0x323   : > { %v1266_v35 = vpop.permute.xlu0 %1265 }
 0x326   : > { %v1311_v40 = vpop.permute.xlu1 %1310 }
 0x327   : > { %v1271_v36 = vpop.permute.xlu0 %1270 }
 0x32a   : > { %v1281_v44 = vpop.permute.xlu1 %1280 }
 0x32b   : > { %v1276_v38 = vpop.permute.xlu0 %1275 }
 0x32e   : > { %v1321_v56 = vpop.permute.xlu1 %1320 }
 0x32f   : > { %v1316_v42 = vpop.permute.xlu0 %1315 }
 0x332   : > { %v1291_v17 = vpop.permute.xlu1 %1290 }
 0x333   : > { %v1286_v48 = vpop.permute.xlu0 %1285 }
 0x336   : > { %v1331_v39 = vpop.permute.xlu1 %1330 }
 0x337   : > { %v1326_v4 = vpop.permute.xlu0 %1325 }
 0x33b   : > { %v1296_v25 = vpop.permute.xlu0 %1295 }
 0x369   : > { %v1241_v49 = vpop.f32.mrf.mxu1 }
 0x36a   : > { %v3538_v52 = vrot.slane %v1241_v49, %v1345_v45 }
 0x36b   : > { %v2643_v53 = vpop.f32.mrf.mxu1 }
 0x36c   : > { %v1348_v57 = vadd.f32 %v3538_v52, %v1271_v36  ;;  %v1347_v59 = vadd.f32 %v3538_v52, %v1266_v35  ;;  %v1349_v63 = vadd.f32 %v3538_v52, %v1276_v38  ;;  %v1355_v0 = vadd.f32 %v3538_v52, %v1306_v37  ;;  %v3645_v53 = vld [vmem:[%s3378_s7 + $0x18] sm:$0xff]  }
 0x36d   : > { %v1244_v61 = vpop.f32.mrf.mxu1  ;;  %v1357_v1 = vadd.f32 %v3538_v52, %v1316_v42  ;;  %v1356_v3 = vadd.f32 %v3538_v52, %v1311_v40  ;;  %v1351_v23 = vadd.f32 %v3538_v52, %v1286_v48  ;;  %v1350_v24 = vadd.f32 %v3538_v52, %v1281_v44 }
 0x36e   : > { %vm1364_vm7 = vcmp.gt.f32.partialorder %v1348_v57, 0.0  ;;  %vm1363_vm8 = vcmp.gt.f32.partialorder %v1347_v59, 0.0  ;;  %v1380_v6 = vmul.f32 0.2, %v1348_v57  ;;  %v1379_v7 = vmul.f32 0.2, %v1347_v59 }
 0x36f   : > { %v2644_v5 = vpop.f32.mrf.mxu1  ;;  %vm1365_vm10 = vcmp.gt.f32.partialorder %v1349_v63, 0.0  ;;  %v1381_v10 = vmul.f32 0.2, %v1349_v63  ;;  %vm1371_vm11 = vcmp.gt.f32.partialorder %v1355_v0, 0.0  ;;  %v1387_v11 = vmul.f32 0.2, %v1355_v0 }
 0x370   : > { %v1396_v12 = vsel %vm1364_vm7, %v1348_v57, %v1380_v6  ;;  %v1395_v13 = vsel %vm1363_vm8, %v1347_v59, %v1379_v7  ;;  %v1389_v15 = vmul.f32 0.2, %v1357_v1  ;;  %v1388_v20 = vmul.f32 0.2, %v1356_v3  ;;  %v1336_v57 = vpop.permute.xlu0 %1335  ;;  %v1301_v5 = vpop.permute.xlu1 %1300 }
 0x371   : > { %v3582_v18 = vsel %vm3547_vm5, %v1396_v12, -1e+30  ;;  %v3586_v19 = vsel %vm3555_vm6, %v1395_v13, -1e+30  ;;  %v1397_v21 = vsel %vm1365_vm10, %v1349_v63, %v1381_v10  ;;  %v1403_v22 = vsel %vm1371_vm11, %v1355_v0, %v1387_v11  ;;  %v2625_v63 = vpop.f32.mrf.mxu0 }
 0x372   : > { %1493 = vmax.xlane.f32.xlu1 %v3582_v18  ;;  %1491 = vmax.xlane.f32.xlu0 %v3586_v19  ;;  %vm1373_vm13 = vcmp.gt.f32.partialorder %v1357_v1, 0.0  ;;  %vm1372_vm14 = vcmp.gt.f32.partialorder %v1356_v3, 0.0  ;;  %v3608_v30 = vsel %vm3566_vm9, %v1397_v21, -1e+30  ;;  %v3612_v31 = vsel %vm3573_vm12, %v1403_v22, -1e+30 }
 0x373   : > { %v1405_v32 = vsel %vm1373_vm13, %v1357_v1, %v1389_v15  ;;  %v1404_v33 = vsel %vm1372_vm14, %v1356_v3, %v1388_v20  ;;  %v1383_v35 = vmul.f32 0.2, %v1351_v23  ;;  %v1382_v36 = vmul.f32 0.2, %v1350_v24  ;;  %v1132_v0 = vpop.f32.mrf.mxu0 }
 0x374   : > { %v1359_v37 = vadd.f32 %v3538_v52, %v1326_v4  ;;  %v1358_v38 = vadd.f32 %v3538_v52, %v1321_v56  ;;  %vm1367_vm1 = vcmp.gt.f32.partialorder %v1351_v23, 0.0  ;;  %vm1366_vm2 = vcmp.gt.f32.partialorder %v1350_v24, 0.0  ;;  %v3665_v4 = vld [vmem:[%s3378_s7 + $0x38] sm:$0xff]  }
 0x375   : > { %v2527_v42 = vunpack.c.l.bf16 %v3615_v34  ;;  %v2524_v44 = vunpack.c.h.bf16 %v3542_v55  ;;  %v3637_v45 = vsel %vm3594_vm15, %v1405_v32, -1e+30  ;;  %v3641_v48 = vsel %vm3600_vm0, %v1404_v33, -1e+30  ;;  %v1341_v33 = vpop.permute.xlu1 %1340 }
 0x376   : > { %1495 = vmax.xlane.f32.xlu1 %v3608_v30  ;;  %1507 = vmax.xlane.f32.xlu0 %v3612_v31  ;;  %v1353_v49 = vadd.f32 %v3538_v52, %v1296_v25  ;;  %v1352_v56 = vadd.f32 %v3538_v52, %v1291_v17  ;;  %v1399_v58 = vsel %vm1367_vm1, %v1351_v23, %v1383_v35  ;;  %v1391_v61 = vmul.f32 0.2, %v1359_v37 }
 0x377   : > { %v1398_v59 = vsel %vm1366_vm2, %v1350_v24, %v1382_v36  ;;  %v1390_v62 = vmul.f32 0.2, %v1358_v38  ;;  %vm1375_vm5 = vcmp.gt.f32.partialorder %v1359_v37, 0.0  ;;  %vm1374_vm6 = vcmp.gt.f32.partialorder %v1358_v38, 0.0 }
 0x378   : > { %vm3652_vm7 = vcmp.gt.f32.partialorder %v2527_v42, 0.0  ;;  %vm3658_vm8 = vcmp.gt.f32.partialorder %v2524_v44, 0.0  ;;  %v4102_v1 = vunpack.c.l.bf16 %v3645_v53  ;;  %v2512_v3 = vunpack.c.h.bf16 %v3578_v16 }
 0x379   : > { %v1361_v6 = vadd.f32 %v3538_v52, %v1336_v57  ;;  %v3670_v7 = vsel %vm3623_vm3, %v1399_v58, -1e+30  ;;  %v3674_v8 = vsel %vm3629_vm4, %v1398_v59, -1e+30  ;;  %v1385_v10 = vmul.f32 0.2, %v1353_v49 }
 0x37a   : > { %1511 = vmax.xlane.f32.xlu1 %v3637_v45  ;;  %1509 = vmax.xlane.f32.xlu0 %v3641_v48  ;;  %v1407_v11 = vsel %vm1375_vm5, %v1359_v37, %v1391_v61  ;;  %v1406_v12 = vsel %vm1374_vm6, %v1358_v38, %v1390_v62  ;;  %v1384_v13 = vmul.f32 0.2, %v1352_v56  ;;  %v1360_v14 = vadd.f32 %v3538_v52, %v1331_v39 }
 0x37b   : > { %vm1369_vm9 = vcmp.gt.f32.partialorder %v1353_v49, 0.0  ;;  %vm1368_vm10 = vcmp.gt.f32.partialorder %v1352_v56, 0.0  ;;  %vm3681_vm11 = vcmp.gt.f32.partialorder %v4102_v1, 0.0  ;;  %vm3687_vm12 = vcmp.gt.f32.partialorder %v2512_v3, 0.0 }
 0x37c   : > { %v4100_v20 = vunpack.c.l.bf16 %v3665_v4  ;;  %v1393_v21 = vmul.f32 0.2, %v1361_v6  ;;  %v3694_v22 = vsel %vm3652_vm7, %v1407_v11, -1e+30  ;;  %v3698_v23 = vsel %vm3658_vm8, %v1406_v12, -1e+30 }
 0x37d   : > { %v2528_v24 = vunpack.c.h.bf16 %v3615_v34  ;;  %v1401_v25 = vsel %vm1369_vm9, %v1353_v49, %v1385_v10  ;;  %v1400_v26 = vsel %vm1368_vm10, %v1352_v56, %v1384_v13  ;;  %v1392_v27 = vmul.f32 0.2, %v1360_v14 }
 0x37e   : > { %1499 = vmax.xlane.f32.xlu1 %v3670_v7  ;;  %1497 = vmax.xlane.f32.xlu0 %v3674_v8  ;;  %v1354_v32 = vadd.f32 %v3538_v52, %v1301_v5  ;;  %vm1377_vm13 = vcmp.gt.f32.partialorder %v1361_v6, 0.0  ;;  %vm1376_vm14 = vcmp.gt.f32.partialorder %v1360_v14, 0.0  ;;  %vm1457_vm15 = vcmp.gt.f32.partialorder %v4100_v20, 0.0  ;;  %v2626_v5 = vpop.f32.mrf.mxu0 }
 0x37f   : > { %v3708_v35 = vsel %vm3681_vm11, %v1401_v25, -1e+30  ;;  %v3712_v36 = vsel %vm3687_vm12, %v1400_v26, -1e+30  ;;  %vm1456_vm0 = vcmp.gt.f32.partialorder %v2528_v24, 0.0  ;;  %v4101_v37 = vunpack.c.h.bf16 %v3645_v53 }
 0x380   : > { %v1362_v38 = vadd.f32 %v3538_v52, %v1341_v33  ;;  %v1409_v39 = vsel %vm1377_vm13, %v1361_v6, %v1393_v21  ;;  %v1408_v40 = vsel %vm1376_vm14, %v1360_v14, %v1392_v27  ;;  %v1386_v41 = vmul.f32 0.2, %v1354_v32  ;;  %v1135_v6 = vpop.f32.mrf.mxu0 }
 0x381   : > { %vm1370_vm1 = vcmp.gt.f32.partialorder %v1354_v32, 0.0  ;;  %v3720_v49 = vsel %vm1457_vm15, %v1409_v39, -1e+30  ;;  %v3722_v56 = vsel %vm1456_vm0, %v1408_v40, -1e+30  ;;  %vm1450_vm2 = vcmp.gt.f32.partialorder %v4101_v37, 0.0 }
 0x382   : > { %1515 = vmax.xlane.f32.xlu1 %v3694_v22  ;;  %1513 = vmax.xlane.f32.xlu0 %v3698_v23  ;;  %v1394_v57 = vmul.f32 0.2, %v1362_v38  ;;  %v1402_v58 = vsel %vm1370_vm1, %v1354_v32, %v1386_v41  ;;  %v4099_v52 = vunpack.c.h.bf16 %v3665_v4  ;;  %vm1378_vm3 = vcmp.gt.f32.partialorder %v1362_v38, 0.0  ;;  %v2629_v10 = vpop.f32.mrf.mxu0 }
 0x383   : > { %v3729_v59 = vsel %vm1450_vm2, %v1402_v58, -1e+30  ;;  %v1852_v58 = vpack.c.bf16 %v2626_v5, %v2625_v63  ;;  %vm1988_vm5 = vcmask 7168   ;;  %v1477_v5 = vld [vmem:[#allocation2 + $0x10] sm:$0xff]  ;;  %v4168_v16 = vunpack.c.h.bf16 %v3645_v53 }
 0x384   : > { %v1410_v61 = vsel %vm1378_vm3, %v1362_v38, %v1394_v57  ;;  %vm1458_vm4 = vcmp.gt.f32.partialorder %v4099_v52, 0.0  ;;  %v1148_v11 = vpop.f32.mrf.mxu0  ;;  %v4170_v34 = vunpack.c.h.bf16 %v3665_v4 }
 0x385   : > { %v3734_v62 = vsel %vm1458_vm4, %v1410_v61, -1e+30  ;;  %v1851_v61 = vpack.c.bf16 %v1135_v6, %v1132_v0 }
 0x386   : > { %1503 = vmax.xlane.f32.xlu1 %v3708_v35  ;;  %1501 = vmax.xlane.f32.xlu0 %v3712_v36  ;;  %v2630_v12 = vpop.f32.mrf.mxu0 }
 0x387   : > { %v1854_v41 = vpack.c.bf16 %v2630_v12, %v2629_v10  ;;  %v1476_v10 = vld [vmem:[#allocation2 + $0x8] sm:$0xff] }
 0x388   : > { %v1151_v13 = vpop.f32.mrf.mxu0 }
 0x389   : > { %v1853_v57 = vpack.c.bf16 %v1151_v13, %v1148_v11  ;;  %v1475_v11 = vld [vmem:[#allocation2] sm:$0xff] }
 0x38a   : > { %1519 = vmax.xlane.f32.xlu1 %v3720_v49  ;;  %1517 = vmax.xlane.f32.xlu0 %v3722_v56  ;;  %v2633_v14 = vpop.f32.mrf.mxu0 }
 0x38c   : > { %v1164_v15 = vpop.f32.mrf.mxu0 }
 0x38e   : > { %1505 = vmax.xlane.f32.xlu0 %v3729_v59  ;;  %v2634_v17 = vpop.f32.mrf.mxu0 }
 0x38f   : > { %v1856_v39 = vpack.c.bf16 %v2634_v17, %v2633_v14 }
 0x390   : > { %v1167_v21 = vpop.f32.mrf.mxu0 }
 0x391   : > { %v1855_v40 = vpack.c.bf16 %v1167_v21, %v1164_v15  ;;  %v3737_v15 = vld [vmem:[#allocation2 + $0x40] sm:$0xff] }
 0x392   : > { %1521 = vmax.xlane.f32.xlu0 %v3734_v62  ;;  %v2637_v25 = vpop.f32.mrf.mxu0 }
 0x394   : > { %v1180_v26 = vpop.f32.mrf.mxu0 }
 0x396   : > { %v2638_v27 = vpop.f32.mrf.mxu0 }
 0x397   : > { %v1858_v32 = vpack.c.bf16 %v2638_v27, %v2637_v25  ;;  %v3744_v25 = vld [vmem:[#allocation2 + $0x50] sm:$0xff] }
 0x398   : > { %v1183_v33 = vpop.f32.mrf.mxu0 }
 0x399   : > { %2645 = vmatprep.subr.bf16.mxu0 %v1858_v32  ;;  %2681 = vmatprep.subr.bf16.mxu1 %v1858_v32  ;;  %v1857_v38 = vpack.c.bf16 %v1183_v33, %v1180_v26  ;;  %v3746_v26 = vld [vmem:[#allocation2 + $0x48] sm:$0xff] }
 0x39a   : > { %2646 = vmatpush3.bf16.msra.mxu0 %v1858_v32  ;;  %2689 = vmatpush3.bf16.msra.mxu1 %v1858_v32 }
 0x39b   : > { %2647 = vmatprep.subr.bf16.mxu0 %v1857_v38  ;;  %2682 = vmatprep.subr.bf16.mxu1 %v1857_v38 }
 0x39e   : > { %2648 = vmatpush3.bf16.msra.mxu0 %v1857_v38  ;;  %2690 = vmatpush3.bf16.msra.mxu1 %v1857_v38 }
 0x39f   : > { %2649 = vmatprep.subr.bf16.mxu0 %v1856_v39  ;;  %2683 = vmatprep.subr.bf16.mxu1 %v1856_v39 }
 0x3a2   : > { %2650 = vmatpush3.bf16.msra.mxu0 %v1856_v39  ;;  %2691 = vmatpush3.bf16.msra.mxu1 %v1856_v39 }
 0x3a3   : > { %2651 = vmatprep.subr.bf16.mxu0 %v1855_v40  ;;  %2684 = vmatprep.subr.bf16.mxu1 %v1855_v40 }
 0x3a6   : > { %2652 = vmatpush3.bf16.msra.mxu0 %v1855_v40  ;;  %2692 = vmatpush3.bf16.msra.mxu1 %v1855_v40  ;;  %v1479_v40 = vld [vmem:[#allocation2 + $0x20] sm:$0xff] }
 0x3a7   : > { %2653 = vmatprep.subr.bf16.mxu0 %v1854_v41  ;;  %2685 = vmatprep.subr.bf16.mxu1 %v1854_v41 }
 0x3aa   : > { %2654 = vmatpush3.bf16.msra.mxu0 %v1854_v41  ;;  %2693 = vmatpush3.bf16.msra.mxu1 %v1854_v41  ;;  %v1478_v41 = vld [vmem:[#allocation2 + $0x18] sm:$0xff] }
 0x3ab   : > { %2655 = vmatprep.subr.bf16.mxu0 %v1853_v57  ;;  %2686 = vmatprep.subr.bf16.mxu1 %v1853_v57 }
 0x3ae   : > { %2656 = vmatpush3.bf16.msra.mxu0 %v1853_v57  ;;  %2694 = vmatpush3.bf16.msra.mxu1 %v1853_v57 }
 0x3af   : > { %2657 = vmatprep.subr.bf16.mxu0 %v1852_v58  ;;  %2687 = vmatprep.subr.bf16.mxu1 %v1852_v58 }
 0x3b2   : > { %2658 = vmatpush3.bf16.msra.mxu0 %v1852_v58  ;;  %2695 = vmatpush3.bf16.msra.mxu1 %v1852_v58 }
 0x3b3   : > { %2659 = vmatprep.subr.bf16.mxu0 %v1851_v61  ;;  %2688 = vmatprep.subr.bf16.mxu1 %v1851_v61 }
 0x3b6   : > { %2660 = vmatpush3.bf16.msra.mxu0 %v1851_v61  ;;  %2696 = vmatpush3.bf16.msra.mxu1 %v1851_v61 }
 0x3fb   : > { %v1494_v12 = vpop.xlane.xlu1 %1493  ;;  %v1492_v13 = vpop.xlane.xlu0 %1491 }
 0x3fc   : > { %v1524_v14 = vmax.f32 %v1476_v10, %v1494_v12  ;;  %v1523_v63 = vmax.f32 %v1475_v11, %v1492_v13 }
 0x3fe   : > { %1990 = vst.msk [vmem:[#allocation2 + $0x8] sm:$0xff] %vm1988_vm5, %v1524_v14  ;;  %1989 = vst.msk [vmem:[#allocation2] sm:$0xff] %vm1988_vm5, %v1523_v63  ;;  %1594 = vperm.xlu0 %2856, %v1524_v14   ;;  %1589 = vperm.xlu1 %2857, %v1523_v63   ;;  %v1539_v33 = vsub.f32 %v1475_v11, %v1523_v63  ;;  %v3764_v63 = vld [vmem:[#allocation2 + $0x60] sm:$0xff] }
 0x3ff   : > { %v1496_v0 = vpop.xlane.xlu1 %1495  ;;  %v1508_v6 = vpop.xlane.xlu0 %1507 }
 0x400   : > { %v1525_v17 = vmax.f32 %v1477_v5, %v1496_v0  ;;  %v3742_v21 = vmax.f32 %v3737_v15, %v1508_v6  ;;  %v1555_v61 = vmul.f32 1.442695, %v1539_v33  ;;  %v3766_v0 = vld [vmem:[#allocation2 + $0x58] sm:$0xff]  ;;  %v1540_v6 = vsub.f32 %v1476_v10, %v1524_v14  ;;  %v1481_v33 = vld [vmem:[#allocation2 + $0x30] sm:$0xff] }
 0x402   : > { %1991 = vst.msk [vmem:[#allocation2 + $0x10] sm:$0xff] %vm1988_vm5, %v1525_v17  ;;  %1997 = vst.msk [vmem:[#allocation2 + $0x40] sm:$0xff] %vm1988_vm5, %v3742_v21  ;;  %1599 = vperm.xlu0 %2856, %v1525_v17   ;;  %1629 = vperm.xlu1 %2857, %v3742_v21   ;;  %v1541_v11 = vsub.f32 %v1477_v5, %v1525_v17  ;;  %2868 = vpow2.f32 %v1555_v61  ;;  %v1557_v10 = vmul.f32 1.442695, %v1540_v6 }
 0x403   : > { %v1512_v27 = vpop.xlane.xlu1 %1511  ;;  %v1510_v32 = vpop.xlane.xlu0 %1509 }
 0x404   : > { %v3753_v38 = vmax.f32 %v3744_v25, %v1512_v27  ;;  %v3756_v39 = vmax.f32 %v3746_v26, %v1510_v32  ;;  %v1559_v20 = vmul.f32 1.442695, %v1541_v11 }
 0x406   : > { %1999 = vst.msk [vmem:[#allocation2 + $0x50] sm:$0xff] %vm1988_vm5, %v3753_v38  ;;  %1998 = vst.msk [vmem:[#allocation2 + $0x48] sm:$0xff] %vm1988_vm5, %v3756_v39  ;;  %1639 = vperm.xlu0 %2856, %v3753_v38   ;;  %1634 = vperm.xlu1 %2857, %v3756_v39   ;;  %2870 = vpow2.f32 %v1559_v20 }
 0x407   : > { %v1500_v57 = vpop.xlane.xlu1 %1499  ;;  %v1498_v58 = vpop.xlane.xlu0 %1497  ;;  %2872 = vpow2.f32 %v1557_v10  ;;  %v1482_v10 = vld [vmem:[#allocation2 + $0x38] sm:$0xff] }
 0x408   : > { %v1527_v12 = vmax.f32 %v1479_v40, %v1500_v57  ;;  %v1526_v13 = vmax.f32 %v1478_v41, %v1498_v58  ;;  %v1480_v57 = vld [vmem:[#allocation2 + $0x28] sm:$0xff] }
 0x40a   : > { %1993 = vst.msk [vmem:[#allocation2 + $0x20] sm:$0xff] %vm1988_vm5, %v1527_v12  ;;  %1992 = vst.msk [vmem:[#allocation2 + $0x18] sm:$0xff] %vm1988_vm5, %v1526_v13  ;;  %1609 = vperm.xlu0 %2856, %v1527_v12   ;;  %1604 = vperm.xlu1 %2857, %v1526_v13   ;;  %v1543_v27 = vsub.f32 %v1479_v40, %v1527_v12  ;;  %v1542_v40 = vsub.f32 %v1478_v41, %v1526_v13  ;;  %v1489_v12 = vld [vmem:[#allocation2 + $0x70] sm:$0xff] }
 0x40b   : > { %v1516_v32 = vpop.xlane.xlu1 %1515  ;;  %v1514_v52 = vpop.xlane.xlu0 %1513 }
 0x40c   : > { %v3771_v5 = vmax.f32 %v3764_v63, %v1516_v32  ;;  %v3774_v17 = vmax.f32 %v3766_v0, %v1514_v52  ;;  %v1563_v14 = vmul.f32 1.442695, %v1543_v27  ;;  %v3782_v32 = vld [vmem:[#allocation2 + $0x68] sm:$0xff]  ;;  %v1547_v27 = vsub.f32 %v3737_v15, %v3742_v21 }
 0x40d   : > { %v1561_v41 = vmul.f32 1.442695, %v1542_v40  ;;  %v1549_v15 = vsub.f32 %v3744_v25, %v3753_v38 }
 0x40e   : > { %2001 = vst.msk [vmem:[#allocation2 + $0x60] sm:$0xff] %vm1988_vm5, %v3771_v5  ;;  %2000 = vst.msk [vmem:[#allocation2 + $0x58] sm:$0xff] %vm1988_vm5, %v3774_v17  ;;  %1649 = vperm.xlu0 %2856, %v3771_v5   ;;  %1644 = vperm.xlu1 %2857, %v3774_v17   ;;  %2874 = vpow2.f32 %v1563_v14  ;;  %v1551_v25 = vsub.f32 %v3764_v63, %v3771_v5 }
 0x40f   : > { %v1504_v58 = vpop.xlane.xlu1 %1503  ;;  %v1502_v61 = vpop.xlane.xlu0 %1501  ;;  %2876 = vpow2.f32 %v1561_v41 }
 0x410   : > { %v1529_v52 = vmax.f32 %v1481_v33, %v1504_v58  ;;  %v1528_v11 = vmax.f32 %v1480_v57, %v1502_v61 }
 0x412   : > { %v1545_v6 = vsub.f32 %v1481_v33, %v1529_v52  ;;  %1995 = vst.msk [vmem:[#allocation2 + $0x30] sm:$0xff] %vm1988_vm5, %v1529_v52  ;;  %1994 = vst.msk [vmem:[#allocation2 + $0x28] sm:$0xff] %vm1988_vm5, %v1528_v11  ;;  %1619 = vperm.xlu0 %2856, %v1529_v52   ;;  %1614 = vperm.xlu1 %2857, %v1528_v11   ;;  %v1544_v61 = vsub.f32 %v1480_v57, %v1528_v11  ;;  %v1571_v33 = vmul.f32 1.442695, %v1547_v27  ;;  %v2869_v57 = vpop.eup %2868  ;;  %v1490_v52 = vld [vmem:[#allocation2 + $0x78] sm:$0xff] }
 0x413   : > { %v1520_v13 = vpop.xlane.xlu1 %1519  ;;  %v1518_v20 = vpop.xlane.xlu0 %1517  ;;  %v1548_v27 = vsub.f32 %v3746_v26, %v3756_v39  ;;  %v1579_v26 = vmul.f32 1.442695, %v1551_v25 }
 0x414   : > { %v1567_v58 = vmul.f32 1.442695, %v1545_v6  ;;  %v1537_v37 = vmax.f32 %v1489_v12, %v1520_v13  ;;  %v1536_v1 = vmax.f32 %v3782_v32, %v1518_v20  ;;  %v1565_v14 = vmul.f32 1.442695, %v1544_v61  ;;  %v2871_v20 = vpop.eup %2870 }
 0x415   : > { %v1575_v6 = vmul.f32 1.442695, %v1549_v15  ;;  %v1573_v61 = vmul.f32 1.442695, %v1548_v27 }
 0x416   : > { %2003 = vst.msk [vmem:[#allocation2 + $0x70] sm:$0xff] %vm1988_vm5, %v1537_v37  ;;  %2002 = vst.msk [vmem:[#allocation2 + $0x68] sm:$0xff] %vm1988_vm5, %v1536_v1  ;;  %1659 = vperm.xlu0 %2856, %v1537_v37   ;;  %1654 = vperm.xlu1 %2857, %v1536_v1   ;;  %2878 = vpow2.f32 %v1567_v58  ;;  %v2873_v58 = vpop.eup %2872  ;;  %v1553_v39 = vsub.f32 %v1489_v12, %v1537_v37 }
 0x417   : > { %v1506_v21 = vpop.xlane.xlu0 %1505  ;;  %2880 = vpow2.f32 %v1571_v33 }
 0x418   : > { %v1530_v40 = vmax.f32 %v1482_v10, %v1506_v21  ;;  %2882 = vpow2.f32 %v1565_v14  ;;  %v1583_v15 = vmul.f32 1.442695, %v1553_v39  ;;  %v1552_v21 = vsub.f32 %v3782_v32, %v1536_v1 }
 0x419   : > { %2884 = vpow2.f32 %v1575_v6 }
 0x41a   : > { %v1546_v11 = vsub.f32 %v1482_v10, %v1530_v40  ;;  %1996 = vst.msk [vmem:[#allocation2 + $0x38] sm:$0xff] %vm1988_vm5, %v1530_v40  ;;  %1749 = vperm.xlu0 %2856, %v2869_v57   ;;  %1624 = vperm.xlu1 %2857, %v1530_v40   ;;  %v1550_v10 = vsub.f32 %v3766_v0, %v3774_v17  ;;  %v1581_v0 = vmul.f32 1.442695, %v1552_v21 }
 0x41b   : > { %v1522_v13 = vpop.xlane.xlu0 %1521  ;;  %v2875_v33 = vpop.eup %2874 }
 0x41c   : > { %v1569_v38 = vmul.f32 1.442695, %v1546_v11  ;;  %v1538_v41 = vmax.f32 %v1490_v52, %v1522_v13  ;;  %v1577_v63 = vmul.f32 1.442695, %v1550_v10  ;;  %v2877_v5 = vpop.eup %2876 }
 0x41e   : > { %2004 = vst.msk [vmem:[#allocation2 + $0x78] sm:$0xff] %vm1988_vm5, %v1538_v41  ;;  %1759 = vperm.xlu0 %2856, %v2871_v20   ;;  %1664 = vperm.xlu1 %2857, %v1538_v41   ;;  %2886 = vpow2.f32 %v1569_v38  ;;  %v1554_v17 = vsub.f32 %v1490_v52, %v1538_v41 }
 0x41f   : > { %2888 = vpow2.f32 %v1573_v61 }
 0x420   : > { %2890 = vpow2.f32 %v1579_v26  ;;  %v1585_v12 = vmul.f32 1.442695, %v1554_v17 }
 0x421   : > { %2892 = vpow2.f32 %v1577_v63 }
 0x422   : > { %1769 = vperm.xlu0 %2856, %v2875_v33   ;;  %1754 = vperm.xlu1 %2857, %v2873_v58   ;;  %2894 = vpow2.f32 %v1583_v15 }
 0x423   : > { %v2879_v14 = vpop.eup %2878  ;;  %2896 = vpow2.f32 %v1581_v0 }
 0x424   : > { %v2881_v40 = vpop.eup %2880  ;;  %2898 = vpow2.f32 %v1585_v12 }
 0x425   : > { %v2883_v57 = vpop.eup %2882 }
 0x426   : > { %1779 = vperm.xlu0 %2856, %v2879_v14   ;;  %1764 = vperm.xlu1 %2857, %v2877_v5   ;;  %v2885_v37 = vpop.eup %2884 }
 0x42a   : > { %1789 = vperm.xlu0 %2856, %v2881_v40   ;;  %1774 = vperm.xlu1 %2857, %v2883_v57  }
 0x42b   : > { %v2887_v11 = vpop.eup %2886 }
 0x42c   : > { %v2889_v6 = vpop.eup %2888 }
 0x42d   : > { %v2891_v1 = vpop.eup %2890 }
 0x42e   : > { %1799 = vperm.xlu0 %2856, %v2885_v37   ;;  %1784 = vperm.xlu1 %2857, %v2887_v11   ;;  %v2893_v32 = vpop.eup %2892 }
 0x42f   : > { %v2895_v27 = vpop.eup %2894 }
 0x430   : > { %v2897_v13 = vpop.eup %2896 }
 0x431   : > { %v2899_v52 = vpop.eup %2898 }
 0x432   : > { %1809 = vperm.xlu0 %2856, %v2891_v1   ;;  %1794 = vperm.xlu1 %2857, %v2889_v6  }
 0x436   : > { %1819 = vperm.xlu0 %2856, %v2895_v27   ;;  %1804 = vperm.xlu1 %2857, %v2893_v32  }
 0x43a   : > { %1814 = vperm.xlu1 %2857, %v2897_v13  }
 0x43e   : > { %1824 = vperm.xlu1 %2857, %v2899_v52  }
 0x479   : > { %v1590_v25 = vpop.permute.xlu1 %1589  ;;  %v1595_v38 = vpop.permute.xlu0 %1594 }
 0x47a   : > { %v1667_v41 = vsub.f32 %v3586_v19, %v1590_v25  ;;  %v1668_v20 = vsub.f32 %v3582_v18, %v1595_v38 }
 0x47c   : > { %v1683_v58 = vmul.f32 1.442695, %v1667_v41  ;;  %v1685_v61 = vmul.f32 1.442695, %v1668_v20 }
 0x47d   : > { %v1630_v10 = vpop.permute.xlu1 %1629  ;;  %v1600_v33 = vpop.permute.xlu0 %1599 }
 0x47e   : > { %2900 = vpow2.f32 %v1683_v58  ;;  %v1675_v26 = vsub.f32 %v3612_v31, %v1630_v10  ;;  %v1669_v39 = vsub.f32 %v3608_v30, %v1600_v33 }
 0x47f   : > { %2902 = vpow2.f32 %v1685_v61 }
 0x480   : > { %v1699_v63 = vmul.f32 1.442695, %v1675_v26  ;;  %v1687_v14 = vmul.f32 1.442695, %v1669_v39 }
 0x481   : > { %v1635_v5 = vpop.permute.xlu1 %1634  ;;  %v1640_v15 = vpop.permute.xlu0 %1639 }
 0x482   : > { %v1676_v21 = vsub.f32 %v3641_v48, %v1635_v5  ;;  %2904 = vpow2.f32 %v1699_v63  ;;  %v1677_v18 = vsub.f32 %v3637_v45, %v1640_v15 }
 0x484   : > { %v1701_v19 = vmul.f32 1.442695, %v1676_v21  ;;  %v1703_v31 = vmul.f32 1.442695, %v1677_v18 }
 0x485   : > { %v1605_v40 = vpop.permute.xlu1 %1604  ;;  %v1610_v0 = vpop.permute.xlu0 %1609 }
 0x486   : > { %2906 = vpow2.f32 %v1701_v19  ;;  %v1670_v17 = vsub.f32 %v3674_v8, %v1605_v40  ;;  %v1671_v30 = vsub.f32 %v3670_v7, %v1610_v0 }
 0x487   : > { %2908 = vpow2.f32 %v1687_v14 }
 0x488   : > { %v1689_v57 = vmul.f32 1.442695, %v1670_v17  ;;  %v1691_v45 = vmul.f32 1.442695, %v1671_v30 }
 0x489   : > { %v1645_v37 = vpop.permute.xlu1 %1644  ;;  %v1650_v12 = vpop.permute.xlu0 %1649 }
 0x48a   : > { %2910 = vpow2.f32 %v1689_v57  ;;  %v1678_v48 = vsub.f32 %v3698_v23, %v1645_v37  ;;  %v1679_v6 = vsub.f32 %v3694_v22, %v1650_v12  ;;  %v4167_v12 = vunpack.c.l.bf16 %v3645_v53 }
 0x48b   : > { %v2901_v11 = vpop.eup %2900  ;;  %2912 = vpow2.f32 %v1703_v31 }
 0x48c   : > { %v2903_v1 = vpop.eup %2902  ;;  %v1705_v32 = vmul.f32 1.442695, %v1678_v48  ;;  %v1715_v8 = vmul.f32 %v2901_v11, %v2503_v50  ;;  %v1707_v25 = vmul.f32 1.442695, %v1679_v6 }
 0x48d   : > { %v1615_v27 = vpop.permute.xlu1 %1614  ;;  %v1620_v13 = vpop.permute.xlu0 %1619  ;;  %v1716_v7 = vmul.f32 %v2903_v1, %v2504_v46 }
 0x48e   : > { %2914 = vpow2.f32 %v1705_v32  ;;  %v1672_v52 = vsub.f32 %v3712_v36, %v1615_v27  ;;  %v1673_v23 = vsub.f32 %v3708_v35, %v1620_v13 }
 0x48f   : > { %v1843_v38 = vpack.c.bf16 %v1716_v7, %v1715_v8  ;;  %2916 = vpow2.f32 %v1691_v45  ;;  %v2905_v41 = vpop.eup %2904 }
 0x490   : > { %v1693_v22 = vmul.f32 1.442695, %v1672_v52  ;;  %v1695_v43 = vmul.f32 1.442695, %v1673_v23  ;;  %v1723_v35 = vmul.f32 %v2905_v41, %v2519_v60  ;;  %v1731_v41 = vld [vmem:[#allocation3 + $0x30] sm:$0xff] }
 0x491   : > { %2661 = vmatprep.mubr.bf16.mxu0 %v1843_v38  ;;  %v1655_v20 = vpop.permute.xlu1 %1654  ;;  %v1660_v58 = vpop.permute.xlu0 %1659  ;;  %v1733_v38 = vld [vmem:[#allocation3 + $0x58] sm:$0xff] }
 0x492   : > { %2918 = vpow2.f32 %v1693_v22  ;;  %v1680_v50 = vsub.f32 %v3722_v56, %v1655_v20  ;;  %v1681_v36 = vsub.f32 %v3720_v49, %v1660_v58  ;;  %v1734_v58 = vld [vmem:[#allocation3 + $0x18] sm:$0xff] }
 0x493   : > { %v2907_v61 = vpop.eup %2906  ;;  %2920 = vpow2.f32 %v1707_v25 }
 0x494   : > { %v2909_v46 = vpop.eup %2908  ;;  %v1709_v10 = vmul.f32 1.442695, %v1680_v50  ;;  %v1724_v33 = vmul.f32 %v2907_v61, %v2520_v9  ;;  %v1711_v15 = vmul.f32 1.442695, %v1681_v36  ;;  %v1739_v36 = vld [vmem:[#allocation3 + $0x40] sm:$0xff] }
 0x495   : > { %v1625_v26 = vpop.permute.xlu1 %1624  ;;  %v1717_v56 = vmul.f32 %v2909_v46, %v2507_v54  ;;  %v1750_v32 = vpop.permute.xlu0 %1749 }
 0x496   : > { %2922 = vpow2.f32 %v1709_v10  ;;  %v1674_v39 = vsub.f32 %v3729_v59, %v1625_v26  ;;  %v1847_v63 = vpack.c.bf16 %v1724_v33, %v1723_v35  ;;  %v1732_v10 = vld [vmem:[#allocation3] sm:$0xff] }
 0x497   : > { %v2911_v5 = vpop.eup %2910  ;;  %2924 = vpow2.f32 %v1695_v43  ;;  %v1827_v43 = vmul.f32 %v1750_v32, %v1731_v41 }
 0x498   : > { %v1697_v21 = vmul.f32 1.442695, %v1674_v39  ;;  %2669 = vmatprep.mubr.bf16.mxu1 %v1847_v63  ;;  %v1718_v49 = vmul.f32 %v2911_v5, %v2508_v29  ;;  %v2913_v60 = vpop.eup %2912  ;;  %v1742_v5 = vld [vmem:[#allocation3 + $0x38] sm:$0xff] }
 0x499   : > { %v1665_v14 = vpop.permute.xlu1 %1664  ;;  %v1725_v54 = vmul.f32 %v2913_v60, %v2523_v2  ;;  %v1760_v27 = vpop.permute.xlu0 %1759 }
 0x49a   : > { %2926 = vpow2.f32 %v1697_v21  ;;  %v1682_v51 = vsub.f32 %v3734_v62, %v1665_v14  ;;  %v1844_v9 = vpack.c.bf16 %v1718_v49, %v1717_v56  ;;  %v1829_v20 = vmul.f32 %v1760_v27, %v1733_v38 }
 0x49b   : > { %v2915_v19 = vpop.eup %2914  ;;  %2928 = vpow2.f32 %v1711_v15 }
 0x49c   : > { %v1713_v59 = vmul.f32 1.442695, %v1682_v51  ;;  %2662 = vmatmul.mubr.bf16.vlgmr.msra.gmra.mxu0 %v1844_v9  ;;  %v1726_v18 = vmul.f32 %v2915_v19, %v2524_v44  ;;  %v2917_v40 = vpop.eup %2916  ;;  %v1740_v51 = vld [vmem:[#allocation3 + $0x20] sm:$0xff] }
 0x49d   : > { %v1719_v62 = vmul.f32 %v2917_v40, %v2511_v28  ;;  %v1755_v8 = vpop.permute.xlu1 %1754  ;;  %v1770_v7 = vpop.permute.xlu0 %1769 }
 0x49e   : > { %2930 = vpow2.f32 %v1713_v59  ;;  %v1848_v47 = vpack.c.bf16 %v1726_v18, %v1725_v54  ;;  %v1828_v21 = vmul.f32 %v1755_v8, %v1732_v10 }
 0x49f   : > { %v2919_v29 = vpop.eup %2918 }
 0x4a0   : > { %v2921_v0 = vpop.eup %2920  ;;  %2670 = vmatmul.mubr.bf16.vlgmr.msra.gmra.mxu1 %v1848_v47  ;;  %v1720_v17 = vmul.f32 %v2919_v29, %v2512_v3 }
 0x4a1   : > { %v1727_v2 = vmul.f32 %v2921_v0, %v2527_v42  ;;  %v4169_v42 = vunpack.c.l.bf16 %v3665_v4  ;;  %v1765_v13 = vpop.permute.xlu1 %1764  ;;  %v1780_v52 = vpop.permute.xlu0 %1779  ;;  %v1741_v4 = vld [vmem:[#allocation3 + $0x10] sm:$0xff] }
 0x4a2   : > { %v1845_v31 = vpack.c.bf16 %v1720_v17, %v1719_v62  ;;  %v1830_v33 = vmul.f32 %v1765_v13, %v1734_v58 }
 0x4a3   : > { %v2923_v57 = vpop.eup %2922 }
 0x4a4   : > { %2665 = vmatprep.mubr.bf16.mxu0 %v1845_v31  ;;  %v1728_v55 = vmul.f32 %v2923_v57, %v2528_v24  ;;  %v2925_v44 = vpop.eup %2924  ;;  %v1737_v31 = vld [vmem:[#allocation3 + $0x8] sm:$0xff] }
 0x4a5   : > { %v1721_v28 = vmul.f32 %v2925_v44, %v4167_v12  ;;  %v3851_v53 = vpop.permute.xlu1 %1774  ;;  %v1790_v23 = vpop.permute.xlu0 %1789  ;;  %v1738_v44 = vld [vmem:[#allocation3 + $0x48] sm:$0xff] }
 0x4a6   : > { %v1849_v30 = vpack.c.bf16 %v1728_v55, %v1727_v2  ;;  %v1835_v49 = vmul.f32 %v1790_v23, %v1739_v36  ;;  %v1735_v2 = vld [vmem:[#allocation3 + $0x50] sm:$0xff]  ;;  %v1833_v55 = vmul.f32 %v1780_v52, %v1737_v31 }
 0x4a7   : > { %v2927_v37 = vpop.eup %2926  ;;  %v1744_v23 = vld [vmem:[#allocation3 + $0x70] sm:$0xff] }
 0x4a8   : > { %2673 = vmatprep.mubr.bf16.mxu1 %v1849_v30  ;;  %v1722_v3 = vmul.f32 %v2927_v37, %v4168_v16  ;;  %v2929_v48 = vpop.eup %2928  ;;  %v1745_v30 = vld [vmem:[#allocation3 + $0x78] sm:$0xff] }
 0x4a9   : > { %v1729_v1 = vmul.f32 %v2929_v48, %v4169_v42  ;;  %v1785_v25 = vpop.permute.xlu1 %1784  ;;  %v1800_v50 = vpop.permute.xlu0 %1799  ;;  %v1743_v48 = vld [vmem:[#allocation3 + $0x60] sm:$0xff] }
 0x4aa   : > { %v1846_v11 = vpack.c.bf16 %v1722_v3, %v1721_v28  ;;  %v1837_v26 = vmul.f32 %v1800_v50, %v1741_v4  ;;  %v1831_v28 = vmul.f32 %v1770_v7, %v1735_v2  ;;  %v1736_v3 = vld [vmem:[#allocation3 + $0x68] sm:$0xff] }
 0x4ab   : > { %v2931_v6 = vpop.eup %2930  ;;  %v1832_v8 = vmul.f32 %v3851_v53, %v1736_v3 }
 0x4ac   : > { %2666 = vmatmul.mubr.bf16.gmra.mxu0 %v1846_v11  ;;  %v1730_v24 = vmul.f32 %v2931_v6, %v4170_v34  ;;  %v1834_v6 = vmul.f32 %v1785_v25, %v1738_v44 }
 0x4ad   : > { %v1795_v22 = vpop.permute.xlu1 %1794  ;;  %v1810_v0 = vpop.permute.xlu0 %1809 }
 0x4ae   : > { %v1850_v45 = vpack.c.bf16 %v1730_v24, %v1729_v1  ;;  %v1836_v47 = vmul.f32 %v1795_v22, %v1740_v51  ;;  %v1746_v24 = vld [vmem:[#allocation3 + $0x28] sm:$0xff]  ;;  %v1839_v27 = vmul.f32 %v1810_v0, %v1743_v48 }
 0x4b0   : > { %2674 = vmatmul.mubr.bf16.gmra.mxu1 %v1850_v45 }
 0x4b1   : > { %v1805_v39 = vpop.permute.xlu1 %1804  ;;  %v1820_v37 = vpop.permute.xlu0 %1819 }
 0x4b2   : > { %v1838_v59 = vmul.f32 %v1805_v39, %v1742_v5  ;;  %v1841_v42 = vmul.f32 %v1820_v37, %v1745_v30 }
 0x4b5   : > { %v1815_v57 = vpop.permute.xlu1 %1814 }
 0x4b6   : > { %v1840_v58 = vmul.f32 %v1815_v57, %v1744_v23 }
 0x4b9   : > { %v1825_v1 = vpop.permute.xlu1 %1824 }
 0x4ba   : > { %v1842_v22 = vmul.f32 %v1825_v1, %v1746_v24 }
 0x55c   : > { %v2663_v61 = vpop.f32.mrf.mxu0 }
 0x55d   : > { %v1958_v46 = vadd.f32 %v2663_v61, %v1829_v20 }
 0x55e   : > { %v1893_v35 = vpop.f32.mrf.mxu0 }
 0x55f   : > { %1974 = vst [vmem:[#allocation3 + $0x58] sm:$0xff] %v1958_v46  ;;  %v1956_v63 = vadd.f32 %v1893_v35, %v1827_v43 }
 0x560   : > { %v2664_v56 = vpop.f32.mrf.mxu0  ;;  %v2671_v15 = vpop.f32.mrf.mxu1 }
 0x561   : > { %1972 = vst [vmem:[#allocation3 + $0x30] sm:$0xff] %v1956_v63  ;;  %v1959_v60 = vadd.f32 %v2664_v56, %v1830_v33  ;;  %v1966_v14 = vadd.f32 %v2671_v15, %v1837_v26 }
 0x562   : > { %v1896_v9 = vpop.f32.mrf.mxu0  ;;  %v1925_v19 = vpop.f32.mrf.mxu1 }
 0x563   : > { %1975 = vst [vmem:[#allocation3 + $0x18] sm:$0xff] %v1959_v60  ;;  %1982 = vst [vmem:[#allocation3 + $0x10] sm:$0xff] %v1966_v14  ;;  %v1957_v54 = vadd.f32 %v1896_v9, %v1828_v21  ;;  %v1964_v18 = vadd.f32 %v1925_v19, %v1835_v49 }
 0x564   : > { %v2672_v40 = vpop.f32.mrf.mxu1 }
 0x565   : > { %1973 = vst [vmem:[#allocation3] sm:$0xff] %v1957_v54  ;;  %1980 = vst [vmem:[#allocation3 + $0x40] sm:$0xff] %v1964_v18  ;;  %v1967_v29 = vadd.f32 %v2672_v40, %v1838_v59 }
 0x566   : > { %v1928_v62 = vpop.f32.mrf.mxu1 }
 0x567   : > { %1983 = vst [vmem:[#allocation3 + $0x38] sm:$0xff] %v1967_v29  ;;  %v1965_v17 = vadd.f32 %v1928_v62, %v1836_v47 }
 0x569   : > { %1981 = vst [vmem:[#allocation3 + $0x20] sm:$0xff] %v1965_v17 }
 0x56c   : > { %v2667_v12 = vpop.f32.mrf.mxu0 }
 0x56d   : > { %v1962_v16 = vadd.f32 %v2667_v12, %v1833_v55 }
 0x56e   : > { %v1909_v11 = vpop.f32.mrf.mxu0 }
 0x56f   : > { %1978 = vst [vmem:[#allocation3 + $0x8] sm:$0xff] %v1962_v16  ;;  %v1960_v34 = vadd.f32 %v1909_v11, %v1831_v28 }
 0x570   : > { %v2668_v45 = vpop.f32.mrf.mxu0  ;;  %v2675_v32 = vpop.f32.mrf.mxu1 }
 0x571   : > { %1976 = vst [vmem:[#allocation3 + $0x50] sm:$0xff] %v1960_v34  ;;  %v1963_v13 = vadd.f32 %v2668_v45, %v1834_v6  ;;  %v1970_v52 = vadd.f32 %v2675_v32, %v1841_v42 }
 0x572   : > { %v1912_v7 = vpop.f32.mrf.mxu0  ;;  %v1941_v38 = vpop.f32.mrf.mxu1 }
 0x573   : > { %1979 = vst [vmem:[#allocation3 + $0x48] sm:$0xff] %v1963_v13  ;;  %1986 = vst [vmem:[#allocation3 + $0x78] sm:$0xff] %v1970_v52  ;;  %v1961_v25 = vadd.f32 %v1912_v7, %v1832_v8  ;;  %v1968_v41 = vadd.f32 %v1941_v38, %v1839_v27 }
 0x574   : > { %v2676_v20 = vpop.f32.mrf.mxu1 }
 0x575   : > { %1977 = vst [vmem:[#allocation3 + $0x68] sm:$0xff] %v1961_v25  ;;  %1984 = vst [vmem:[#allocation3 + $0x60] sm:$0xff] %v1968_v41  ;;  %v1971_v4 = vadd.f32 %v2676_v20, %v1842_v22  ;;  %2008 = sbr.rel (%p2491_p1) target bundleno = 1575 (0x627), region = 109 }
 0x576   : > { %v1944_v50 = vpop.f32.mrf.mxu1 }
 0x577   : > { %1987 = vst [vmem:[#allocation3 + $0x28] sm:$0xff] %v1971_v4  ;;  %v1969_v53 = vadd.f32 %v1944_v50, %v1840_v58 }
 0x579   : > { %1985 = vst [vmem:[#allocation3 + $0x70] sm:$0xff] %v1969_v53 }
 0x57a   : > { %v3855_v61 = vld [vmem:[#allocation3 + $0x58] sm:$0xff]  ;;  %v3857_v43 = vld [vmem:[#allocation3 + $0x30] sm:$0xff]  ;;  %v3156_v10 = vmov 33   ;;  %v3862_v36 = vld [vmem:[#allocation3] sm:$0xff] }
 0x57b   : > { %v3859_v46 = vld [vmem:[#allocation3 + $0x18] sm:$0xff]  ;;  %2933 = vset.pattern.permute.xlu1 %v3156_v10  ;;  %2932 = vset.pattern.permute.xlu0 %v3156_v10  ;;  %2934 = vrcp.f32 %v3855_v61  ;;  %v3869_v33 = vld [vmem:[#allocation3 + $0x50] sm:$0xff]  ;;  %v3873_v26 = vld [vmem:[#allocation3 + $0x48] sm:$0xff] }
 0x57c   : > { %2936 = vrcp.f32 %v3857_v43  ;;  %v3867_v35 = vld [vmem:[#allocation3 + $0x68] sm:$0xff]  ;;  %v3879_v63 = vld [vmem:[#allocation3 + $0x20] sm:$0xff]  ;;  %v3885_v49 = vld [vmem:[#allocation3 + $0x38] sm:$0xff] }
 0x57d   : > { %2938 = vrcp.f32 %v3859_v46  ;;  %v3875_v39 = vld [vmem:[#allocation3 + $0x8] sm:$0xff]  ;;  %v3881_v5 = vld [vmem:[#allocation3 + $0x40] sm:$0xff]  ;;  %v3887_v14 = vld [vmem:[#allocation3 + $0x10] sm:$0xff] }
 0x57e   : > { %2940 = vrcp.f32 %v3862_v36  ;;  %v3893_v59 = vld [vmem:[#allocation3 + $0x60] sm:$0xff]  ;;  %v3897_v18 = vld [vmem:[#allocation3 + $0x28] sm:$0xff]  ;;  %v3899_v47 = vld [vmem:[#allocation3 + $0x78] sm:$0xff] }
 0x57f   : > { %2942 = vrcp.f32 %v3867_v35  ;;  %v2043_v44 = vld [vmem:[%s3415_s17 + $0x10] sm:$0xff]  ;;  %v2041_v12 = vld [vmem:[%s3415_s17] sm:$0xff]  ;;  %v2044_v11 = vld [vmem:[%s3415_s17 + $0x18] sm:$0xff] }
 0x580   : > { %2944 = vrcp.f32 %v3869_v33  ;;  %v3891_v9 = vld [vmem:[#allocation3 + $0x70] sm:$0xff]  ;;  %v2042_v1 = vld [vmem:[%s3415_s17 + $0x8] sm:$0xff]  ;;  %v2048_v25 = vld [vmem:[%s3415_s17 + $0x38] sm:$0xff] }
 0x581   : > { %2946 = vrcp.f32 %v3873_v26  ;;  %v2046_v8 = vld [vmem:[%s3415_s17 + $0x28] sm:$0xff]  ;;  %v2045_v52 = vld [vmem:[%s3415_s17 + $0x20] sm:$0xff]  ;;  %v2047_v58 = vld [vmem:[%s3415_s17 + $0x30] sm:$0xff] }
 0x582   : > { %2948 = vrcp.f32 %v3875_v39 }
 0x583   : > { %2950 = vrcp.f32 %v3879_v63 }
 0x584   : > { %2952 = vrcp.f32 %v3881_v5 }
 0x585   : > { %2954 = vrcp.f32 %v3885_v49 }
 0x586   : > { %2956 = vrcp.f32 %v3887_v14 }
 0x587   : > { %2958 = vrcp.f32 %v3891_v9 }
 0x588   : > { %v2935_v56 = vpop.eup %2934  ;;  %2960 = vrcp.f32 %v3893_v59 }
 0x589   : > { %v2937_v15 = vpop.eup %2936  ;;  %2069 = vperm.xlu1 %2933, %v2935_v56   ;;  %2962 = vrcp.f32 %v3897_v18 }
 0x58a   : > { %v2939_v21 = vpop.eup %2938  ;;  %2059 = vperm.xlu0 %2932, %v2937_v15   ;;  %2964 = vrcp.f32 %v3899_v47 }
 0x58b   : > { %v2941_v60 = vpop.eup %2940 }
 0x58c   : > { %v2943_v51 = vpop.eup %2942 }
 0x58d   : > { %2074 = vperm.xlu1 %2933, %v2939_v21   ;;  %v2945_v19 = vpop.eup %2944 }
 0x58e   : > { %2064 = vperm.xlu0 %2932, %v2941_v60   ;;  %v2947_v54 = vpop.eup %2946  ;;  %v2051_v60 = vld [vmem:[%s3415_s17 + $0x50] sm:$0xff] }
 0x58f   : > { %v2949_v40 = vpop.eup %2948 }
 0x590   : > { %v2951_v29 = vpop.eup %2950 }
 0x591   : > { %2084 = vperm.xlu1 %2933, %v2943_v51   ;;  %v2953_v0 = vpop.eup %2952 }
 0x592   : > { %2079 = vperm.xlu0 %2932, %v2945_v19   ;;  %v2955_v62 = vpop.eup %2954 }
 0x593   : > { %v2957_v17 = vpop.eup %2956 }
 0x594   : > { %v2959_v31 = vpop.eup %2958 }
 0x595   : > { %2094 = vperm.xlu1 %2933, %v2947_v54   ;;  %v2961_v57 = vpop.eup %2960 }
 0x596   : > { %2089 = vperm.xlu0 %2932, %v2949_v40   ;;  %v2963_v2 = vpop.eup %2962 }
 0x597   : > { %v2965_v55 = vpop.eup %2964 }
 0x599   : > { %2104 = vperm.xlu1 %2933, %v2951_v29  }
 0x59a   : > { %2099 = vperm.xlu0 %2932, %v2953_v0   ;;  %v2053_v0 = vld [vmem:[%s3415_s17 + $0x60] sm:$0xff] }
 0x59d   : > { %2114 = vperm.xlu1 %2933, %v2955_v62  }
 0x59e   : > { %2109 = vperm.xlu0 %2932, %v2957_v17  }
 0x5a1   : > { %2124 = vperm.xlu1 %2933, %v2959_v31  }
 0x5a2   : > { %2119 = vperm.xlu0 %2932, %v2961_v57   ;;  %v2056_v57 = vld [vmem:[%s3415_s17 + $0x78] sm:$0xff] }
 0x5a5   : > { %2134 = vperm.xlu1 %2933, %v2963_v2  }
 0x5a6   : > { %2129 = vperm.xlu0 %2932, %v2965_v55   ;;  %v2055_v55 = vld [vmem:[%s3415_s17 + $0x70] sm:$0xff] }
 0x604   : > { %v2070_v30 = vpop.permute.xlu1 %2069 }
 0x605   : > { %v2139_v37 = vmul.f32 %v2070_v30, %v3855_v61  ;;  %v2060_v28 = vpop.permute.xlu0 %2059 }
 0x606   : > { %v2137_v16 = vmul.f32 %v2060_v28, %v3857_v43  ;;  %v2050_v43 = vld [vmem:[%s3415_s17 + $0x48] sm:$0xff] }
 0x607   : > { %v2155_v3 = vadd.f32 %v2139_v37, %v2043_v44 }
 0x608   : > { %v2153_v48 = vadd.f32 %v2137_v16, %v2041_v12  ;;  %v2075_v6 = vpop.permute.xlu1 %2074 }
 0x609   : > { %2171 = vst [vmem:[%s3415_s17 + $0x10] sm:$0xff] %v2155_v3  ;;  %v2140_v42 = vmul.f32 %v2075_v6, %v3859_v46  ;;  %v2065_v34 = vpop.permute.xlu0 %2064 }
 0x60a   : > { %2169 = vst [vmem:[%s3415_s17] sm:$0xff] %v2153_v48  ;;  %v2138_v24 = vmul.f32 %v2065_v34, %v3862_v36  ;;  %v2049_v36 = vld [vmem:[%s3415_s17 + $0x40] sm:$0xff] }
 0x60b   : > { %v2156_v45 = vadd.f32 %v2140_v42, %v2044_v11 }
 0x60c   : > { %v2154_v32 = vadd.f32 %v2138_v24, %v2042_v1  ;;  %v2085_v27 = vpop.permute.xlu1 %2084 }
 0x60d   : > { %2172 = vst [vmem:[%s3415_s17 + $0x18] sm:$0xff] %v2156_v45  ;;  %v2142_v13 = vmul.f32 %v2085_v27, %v3867_v35  ;;  %v2080_v23 = vpop.permute.xlu0 %2079 }
 0x60e   : > { %2170 = vst [vmem:[%s3415_s17 + $0x8] sm:$0xff] %v2154_v32  ;;  %v2141_v7 = vmul.f32 %v2080_v23, %v3869_v33 }
 0x60f   : > { %v2158_v38 = vadd.f32 %v2142_v13, %v2046_v8 }
 0x610   : > { %v2157_v22 = vadd.f32 %v2141_v7, %v2045_v52  ;;  %v2095_v41 = vpop.permute.xlu1 %2094 }
 0x611   : > { %2174 = vst [vmem:[%s3415_s17 + $0x28] sm:$0xff] %v2158_v38  ;;  %v2144_v20 = vmul.f32 %v2095_v41, %v3873_v26  ;;  %v2090_v4 = vpop.permute.xlu0 %2089 }
 0x612   : > { %2173 = vst [vmem:[%s3415_s17 + $0x20] sm:$0xff] %v2157_v22  ;;  %v2143_v50 = vmul.f32 %v2090_v4, %v3875_v39  ;;  %v2052_v39 = vld [vmem:[%s3415_s17 + $0x58] sm:$0xff] }
 0x613   : > { %v2160_v53 = vadd.f32 %v2144_v20, %v2048_v25 }
 0x614   : > { %v2159_v61 = vadd.f32 %v2143_v50, %v2047_v58  ;;  %v2105_v46 = vpop.permute.xlu1 %2104 }
 0x615   : > { %2176 = vst [vmem:[%s3415_s17 + $0x38] sm:$0xff] %v2160_v53  ;;  %v2146_v10 = vmul.f32 %v2105_v46, %v3879_v63  ;;  %v2100_v35 = vpop.permute.xlu0 %2099 }
 0x616   : > { %2175 = vst [vmem:[%s3415_s17 + $0x30] sm:$0xff] %v2159_v61  ;;  %v2145_v33 = vmul.f32 %v2100_v35, %v3881_v5  ;;  %v2054_v5 = vld [vmem:[%s3415_s17 + $0x68] sm:$0xff] }
 0x617   : > { %v2162_v26 = vadd.f32 %v2146_v10, %v2050_v43 }
 0x618   : > { %v2161_v56 = vadd.f32 %v2145_v33, %v2049_v36  ;;  %v2115_v15 = vpop.permute.xlu1 %2114 }
 0x619   : > { %2178 = vst [vmem:[%s3415_s17 + $0x48] sm:$0xff] %v2162_v26  ;;  %v2148_v21 = vmul.f32 %v2115_v15, %v3885_v49  ;;  %v2110_v51 = vpop.permute.xlu0 %2109 }
 0x61a   : > { %2177 = vst [vmem:[%s3415_s17 + $0x40] sm:$0xff] %v2161_v56  ;;  %v2147_v63 = vmul.f32 %v2110_v51, %v3887_v14 }
 0x61b   : > { %v2164_v19 = vadd.f32 %v2148_v21, %v2052_v39 }
 0x61c   : > { %v2163_v54 = vadd.f32 %v2147_v63, %v2051_v60  ;;  %v2125_v40 = vpop.permute.xlu1 %2124 }
 0x61d   : > { %2180 = vst [vmem:[%s3415_s17 + $0x58] sm:$0xff] %v2164_v19  ;;  %v2150_v29 = vmul.f32 %v2125_v40, %v3891_v9  ;;  %v2120_v62 = vpop.permute.xlu0 %2119 }
 0x61e   : > { %2179 = vst [vmem:[%s3415_s17 + $0x50] sm:$0xff] %v2163_v54  ;;  %v2149_v49 = vmul.f32 %v2120_v62, %v3893_v59 }
 0x61f   : > { %v2166_v17 = vadd.f32 %v2150_v29, %v2054_v5 }
 0x620   : > { %v2165_v31 = vadd.f32 %v2149_v49, %v2053_v0  ;;  %v2135_v14 = vpop.permute.xlu1 %2134 }
 0x621   : > { %2182 = vst [vmem:[%s3415_s17 + $0x68] sm:$0xff] %v2166_v17  ;;  %v2152_v2 = vmul.f32 %v2135_v14, %v3897_v18  ;;  %v2130_v44 = vpop.permute.xlu0 %2129 }
 0x622   : > { %2181 = vst [vmem:[%s3415_s17 + $0x60] sm:$0xff] %v2165_v31  ;;  %v2151_v30 = vmul.f32 %v2130_v44, %v3899_v47 }
 0x623   : > { %v2168_v9 = vadd.f32 %v2152_v2, %v2056_v57 }
 0x624   : > { %v2167_v37 = vadd.f32 %v2151_v30, %v2055_v55 }
 0x625   : > { %2184 = vst [vmem:[%s3415_s17 + $0x78] sm:$0xff] %v2168_v9 }
 0x626   : > { %2183 = vst [vmem:[%s3415_s17 + $0x70] sm:$0xff] %v2167_v37 }
 0x627 PF: > { %s4171_s3 = sld [smem:[#allocation15_spill]] }
 0x62d   : > { %p2185_p2 = scmp.eq.s32.totalorder %s4171_s3, 1 }
 0x62f   : > { %p2186_p3 = pnand %p2185_p2, %p2005_p0 }
 0x630   : > { %s4172_s30 = sld [smem:[#allocation32_spill]] (!%p2186_p3) }
 0x631   : > { %2189 = sbr.rel (%p2186_p3) target bundleno = 1601 (0x641), region = 113 }
 0x636   : > { %v2190_v59 = vld [vmem:[%s3415_s17] sm:$0xff]  ;;  %v2492_v18 = vld [vmem:[%s4172_s30] ss:$0 sm:$0xff]  ;;  %v2191_v47 = vld [vmem:[%s3415_s17 + $0x8] sm:$0xff] }
 0x637   : > { %v2213_v12 = vadd.f32 %v2492_v18, %v2190_v59  ;;  %v2214_v28 = vadd.f32 %v2492_v18, %v2191_v47  ;;  %v2192_v16 = vld [vmem:[%s3415_s17 + $0x10] sm:$0xff]  ;;  %v2193_v3 = vld [vmem:[%s3415_s17 + $0x18] sm:$0xff]  ;;  %v2194_v48 = vld [vmem:[%s3415_s17 + $0x20] sm:$0xff] }
 0x638   : > { %v2215_v11 = vadd.f32 %v2492_v18, %v2192_v16  ;;  %v2216_v6 = vadd.f32 %v2492_v18, %v2193_v3  ;;  %v2217_v42 = vadd.f32 %v2492_v18, %v2194_v48  ;;  %v2195_v1 = vld [vmem:[%s3415_s17 + $0x28] sm:$0xff]  ;;  %v2196_v34 = vld [vmem:[%s3415_s17 + $0x30] sm:$0xff]  ;;  %v2197_v24 = vld [vmem:[%s3415_s17 + $0x38] sm:$0xff] }
 0x639   : > { %2229 = vst [vmem:[%s3415_s17] sm:$0xff] %v2213_v12  ;;  %2230 = vst [vmem:[%s3415_s17 + $0x8] sm:$0xff] %v2214_v28  ;;  %v2218_v45 = vadd.f32 %v2492_v18, %v2195_v1  ;;  %v2219_v32 = vadd.f32 %v2492_v18, %v2196_v34  ;;  %v2220_v8 = vadd.f32 %v2492_v18, %v2197_v24  ;;  %v2198_v27 = vld [vmem:[%s3415_s17 + $0x40] sm:$0xff]  ;;  %v2199_v13 = vld [vmem:[%s3415_s17 + $0x48] sm:$0xff] }
 0x63a   : > { %v2200_v52 = vld [vmem:[%s3415_s17 + $0x50] sm:$0xff]  ;;  %2231 = vst [vmem:[%s3415_s17 + $0x10] sm:$0xff] %v2215_v11  ;;  %2232 = vst [vmem:[%s3415_s17 + $0x18] sm:$0xff] %v2216_v6  ;;  %v2221_v23 = vadd.f32 %v2492_v18, %v2198_v27  ;;  %v2222_v7 = vadd.f32 %v2492_v18, %v2199_v13  ;;  %v2201_v22 = vld [vmem:[%s3415_s17 + $0x58] sm:$0xff] }
 0x63b   : > { %2233 = vst [vmem:[%s3415_s17 + $0x20] sm:$0xff] %v2217_v42  ;;  %v2223_v38 = vadd.f32 %v2492_v18, %v2200_v52  ;;  %v2202_v25 = vld [vmem:[%s3415_s17 + $0x60] sm:$0xff]  ;;  %v2203_v41 = vld [vmem:[%s3415_s17 + $0x68] sm:$0xff]  ;;  %2234 = vst [vmem:[%s3415_s17 + $0x28] sm:$0xff] %v2218_v45  ;;  %v2224_v20 = vadd.f32 %v2492_v18, %v2201_v22 }
 0x63c   : > { %2235 = vst [vmem:[%s3415_s17 + $0x30] sm:$0xff] %v2219_v32  ;;  %2236 = vst [vmem:[%s3415_s17 + $0x38] sm:$0xff] %v2220_v8  ;;  %v2225_v58 = vadd.f32 %v2492_v18, %v2202_v25  ;;  %v2226_v4 = vadd.f32 %v2492_v18, %v2203_v41  ;;  %v2204_v50 = vld [vmem:[%s3415_s17 + $0x70] sm:$0xff]  ;;  %v2205_v53 = vld [vmem:[%s3415_s17 + $0x78] sm:$0xff] }
 0x63d   : > { %2237 = vst [vmem:[%s3415_s17 + $0x40] sm:$0xff] %v2221_v23  ;;  %2238 = vst [vmem:[%s3415_s17 + $0x48] sm:$0xff] %v2222_v7  ;;  %v2227_v61 = vadd.f32 %v2492_v18, %v2204_v50  ;;  %v2228_v43 = vadd.f32 %v2492_v18, %v2205_v53 }
 0x63e   : > { %2239 = vst [vmem:[%s3415_s17 + $0x50] sm:$0xff] %v2223_v38  ;;  %2240 = vst [vmem:[%s3415_s17 + $0x58] sm:$0xff] %v2224_v20 }
 0x63f   : > { %2241 = vst [vmem:[%s3415_s17 + $0x60] sm:$0xff] %v2225_v58  ;;  %2242 = vst [vmem:[%s3415_s17 + $0x68] sm:$0xff] %v2226_v4 }
 0x640   : > { %2243 = vst [vmem:[%s3415_s17 + $0x70] sm:$0xff] %v2227_v61  ;;  %2244 = vst [vmem:[%s3415_s17 + $0x78] sm:$0xff] %v2228_v43 }
 0x641 PF: > { %s2500_s13 = sshll.u32 %s3128_s15, 11  ;;  %s4173_s24 = sld [smem:[#allocation33_spill]] }
 0x642   : > { %s2259_s10 = sshll.u32 %s3415_s17, 4  ;;  %s4174_s21 = sand.u32 1, %s3092_s28   ;;  %s3996_s10 = int_to_ptr.vmem [resolvable:$true] %s2259_s10 }
 0x643   : > { %s4000_s6 = scalar_lea.sflag [#allocation8], %s4174_s21  ;;  %s2992_s4 = scalar_lea.vmem %s3996_s10, 2048 }
 0x644   : > { %p2993_p7 = scmp.ne.s32.totalorder %s3996_s10, %s2992_s4  ;;  %s3157_s15 = smov [#allocation9]  }
 0x645   : > { %s2996_s23 = sshll.u32 %s3157_s15, 4  ;;  %s2997_s23 = int_to_ptr.vmem [resolvable:$false] %s2996_s23 }
 0x646   : > { %p2994_p9 = pnand %p2993_p7, %p3344_p4  ;;  %s2998_s14 = scalar_lea.vmem %s2997_s23, 4096 }
 0x647   : > { %s3993_s2 = scalar_lea.hbm %s4173_s24, %s2500_s13  ;;  %p2999_p8 = scmp.lt.s32.totalorder %s3996_s10, %s2997_s23 }
 0x648   : > { %p2995_p5 = pneg %p2994_p9  ;;  %p3000_p10 = scmp.lt.s32.totalorder %s2998_s14, %s2992_s4 }
 0x64a   : > { %p3001_p11 = por %p3000_p10, %p2999_p8 }
 0x64c   : > { %p3002_p12 = pnand %p3001_p11, %p2995_p5 }
 0x64e   : > { %3005 = shalt.err (!%p3002_p12)
}
 0x64f   : > { %s3006_s17 = scalar_lea.hbm %s3993_s2, 2048  ;;  %s3010_s5 = scalar_lea.hbm %s4173_s24, 4096 }
 0x650   : > { %p3007_p13 = scmp.ne.s32.totalorder %s3993_s2, %s3006_s17  ;;  %p3011_p2 = scmp.lt.s32.totalorder %s3993_s2, %s4173_s24 }
 0x651   : > { %p3012_p3 = scmp.lt.s32.totalorder %s3010_s5, %s3006_s17 }
 0x652   : > { %p3008_p0 = pnand %p3007_p13, %p3344_p4 }
 0x653   : > { %p3013_p7 = por %p3012_p3, %p3011_p2 }
 0x654   : > { %p3009_p1 = pneg %p3008_p0 }
 0x656   : > { %p3014_p9 = pnand %p3013_p7, %p3009_p1 }
 0x658   : > { %3017 = shalt.err (!%p3014_p9)
}
 0x659   : > { %s3158_s0 = smov 128   ;;  %s3159_s11 = smov 8  }
 0x65a   : > { %2699 = dma.vmem_to_hbm [thread:$0]  (%p3344_p4), %s3996_s10, 2048, %s3993_s2, %s4000_s6, %s3158_s0, %s3158_s0, %s3159_s11  }
 0x65b PF: > { %p2705_p5 = scmp.ge.s32.totalorder %s3144_s19, 2  ;;  %s2274_s8 = sand.u32 1, %s3088_s27  }
 0x65c   : > { %s2275_s3 = scalar_lea.sflag [#allocation8], %s2274_s8 }
 0x65d   : > { %p2702_p8 = pnand %p2705_p5, %p3348_p6 }
 0x65f   : > { %p2703_p10 = pneg %p2702_p8 }
 0x661   : > { %3083 = dma.done.wait (%p2703_p10), %s2275_s3, 2048  }
 0x662   : > { %3085 = vsyncadd (%p2703_p10), %s2275_s3, 4294965248  ;;  %s24_s19 = sadd.s32 1, %s3144_s19   ;;  %s4176_s25 = sld [smem:[#allocation23_spill]] }
 0x663   : > { %p4028_p11 = scmp.ge.s32.totalorder %s24_s19, 10   ;;  %s4177_s30 = sld [smem:[#allocation12_spill]] }
 0x664   : > { %s4178_s9 = sld [smem:[#allocation13_spill]]  ;;  %s4189_s27 = smov %s3092_s28 }
 0x665   : > { %s4179_s10 = sld [smem:[#allocation24_spill]]  ;;  %s4190_s28 = smov %s3096_s29 }
 0x666   : > { %s4180_s11 = sld [smem:[#allocation14_spill]] }
 0x667   : > { %s4181_s12 = sld [smem:[#allocation21_spill]] }
 0x668   : > { %s4182_s13 = sld [smem:[#allocation16_spill]]  ;;  %s4191_s29 = smov %s4176_s25 }
 0x669   : > { %s4183_s14 = sld [smem:[#allocation17_spill]] }
 0x66a   : > { %s4184_s15 = sld [smem:[#allocation18_spill]] }
 0x66b   : > { %s4185_s16 = sld [smem:[#allocation19_spill]] }
 0x66c   : > { %s4186_s17 = sld [smem:[#allocation20_spill]] }
 0x66d   : > { %s4187_s22 = sld [smem:[#allocation22_spill]] }
 0x66f   :  { %23 = sbr.rel (!%p4028_p11) target bundleno = 21 (0x15), region = 174 }
 0x673   : > { %s4192_s18 = smov %s4187_s22 }
 0x674   :  { %2280 = vsyncpa [#allocation7], 1 }
 0x675   :  { %2282 = vsyncpa [#allocation7 + $0x1], 1 }
 0x676   :  { %2283 = vsyncpa [#allocation8], 1 }
 0x677   :  { %2285 = vsyncpa [#allocation8 + $0x1], 1 }

</bundles_post_ra>
